<compile_context>
chip_gen: v6e
topology: v6e:2x2x1
jax: 0.10.0
libtpu: 0.0.40
codegen_flags: <defaults>
</compile_context>

<pallas_src>
import numpy as np
import jax
import jax.numpy as jnp
from jax import lax
from jax.experimental import pallas as pl
from jax.experimental.pallas import tpu as pltpu


# ----------------------------- Pallas kernel ------------------------------

def simple_cnn_kernel(p_ref, cw_ref, g_ref, fb_ref, o_ref):
    #   p_ref : (B, 28, 196)   im2col patches (+ all-ones bias feature), per-example slabs
    #   cw_ref: (32, 28)       conv weight | conv bias (bias as last column)
    #   g_ref : (10, 32, 196)  pool-folded fc weight: G[o,c,s] = sum_q fc_w[o,c,q] * pool[q,s]
    #   fb_ref: (1, 10)        fc bias
    #   o_ref : (B, 10)        logits for this batch block
    B, Kf, S = p_ref.shape
    Cout = cw_ref.shape[0]

    # Conv (+bias) as one batched MXU matmul per block: (B: (32,28)@(28,196)) -> (B,32,196).
    cw_b = jnp.broadcast_to(cw_ref[...][None, :, :], (B, Cout, Kf))
    y = jnp.einsum('bck,bks->bcs', cw_b, p_ref[...],
                   preferred_element_type=jnp.float32)
    y = jnp.maximum(y, 0.0)                                            # ReLU (VPU)

    # Pool-folded fully-connected layer, unrolled over the 10 classes:
    #   out[b,o] = sum_{c,s} y[b,c,s] * G[o,c,s]    (two lane reductions per class)
    lane = lax.broadcasted_iota(jnp.int32, (1, 10), 1)
    out = jnp.zeros((B, 10), jnp.float32)
    for o in range(10):
        g_o = g_ref[o][None, :, :].astype(jnp.float32)                 # (1, 32, 196)
        t = jnp.sum(y * g_o, axis=2)                                   # (B, 32)
        col = jnp.sum(t, axis=1, keepdims=True)                        # (B, 1)
        out = out + jnp.where(lane == o, col, 0.0)                     # place in lane o
    o_ref[...] = out + fb_ref[...]


# --------------------------- one-time param prep ---------------------------

def adaptive_pool_matrix(in_size, out_size):
    """PyTorch adaptive_avg_pool1d semantics as an (out, in) averaging matrix."""
    m = np.zeros((out_size, in_size), np.float32)
    for i in range(out_size):
        s = (i * in_size) // out_size
        e = -((-(i + 1) * in_size) // out_size)  # ceil
        m[i, s:e] = 1.0 / (e - s)
    return m


def prepare_params(conv_w_oihw, conv_b, fc_w, fc_b, *, H=16, W=16, K=3, OH=13, OW=13,
                   compute_dtype=jnp.float32):
    """Hoisted out of the per-forward path: run once at init.

    compute_dtype=jnp.bfloat16 is recommended on v6e/v7x (bf16 MXU fast path, half the patch
    DMA / VMEM); keep float32 when matching the f32 reference to 1e-3.
    """
    Cout, Cin, _, _ = conv_w_oihw.shape
    Ho, Wo = H - K + 1, W - K + 1
    cw = np.asarray(conv_w_oihw, np.float32).reshape(Cout, Cin * K * K)           # (32, 27)
    cwb = np.concatenate(
        [cw, np.asarray(conv_b, np.float32).reshape(Cout, 1)], axis=1)            # (32, 28)
    pool = np.kron(adaptive_pool_matrix(Ho, OH), adaptive_pool_matrix(Wo, OW))    # (169, 196)
    fw3 = np.asarray(fc_w, np.float32).reshape(10, Cout, OH * OW)                 # (10, 32, 169)
    g = np.einsum('ocq,qs->ocs', fw3, pool)                                       # (10, 32, 196)
    fb = np.asarray(fc_b, np.float32).reshape(1, 10)
    return (jnp.asarray(cwb, compute_dtype),
            jnp.asarray(g, compute_dtype),
            jnp.asarray(fb, jnp.float32))


# ------------------------------- forward pass -------------------------------

def _round_up(v, m):
    return ((v + m - 1) // m) * m


def _choose_block(n):
    """Examples per grid step; multiple of 8 whenever there is more than one step."""
    if n < 16:
        return n, 1                                   # single block covering the whole batch
    b = min(64, _round_up(pl.cdiv(n, 2), 8))          # >=2 blocks so v7x's 2nd TC isn't idle
    return b, pl.cdiv(n, b)


@jax.jit
def simple_cnn_forward(x_nchw, cwb, g, fb):
    N, Cin, H, W = x_nchw.shape
    K = 3
    Ho, Wo = H - K + 1, W - K + 1                     # 14, 14
    S = Ho * Wo                                       # 196
    Cout, Kf = cwb.shape                              # 32, 28
    dtype = cwb.dtype

    # im2col (XLA-fused inside this jit), feature order cin*9 + kh*3 + kw, plus a ones feature
    # so the conv bias rides inside the conv matmul.
    slabs = [x_nchw[:, :, i:i + Ho, j:j + Wo] for i in range(K) for j in range(K)]
    p = jnp.stack(slabs, axis=2).reshape(N, Cin * K * K, S).astype(dtype)         # (N, 27, 196)
    p = jnp.concatenate([p, jnp.ones((N, 1, S), dtype)], axis=1)                  # (N, 28, 196)

    B, nb = _choose_block(N)
    Np = nb * B
    if Np != N:
        p = jnp.pad(p, ((0, Np - N), (0, 0), (0, 0)))  # zero rows -> zero logits, sliced off

    out = pl.pallas_call(
        simple_cnn_kernel,
        out_shape=jax.ShapeDtypeStruct((Np, 10), jnp.float32),
        grid=(nb,),
        in_specs=[
            pl.BlockSpec((B, Kf, S), lambda n: (n, 0, 0)),       # patches (+bias feature)
            pl.BlockSpec((Cout, Kf), lambda n: (0, 0)),          # conv weight | bias
            pl.BlockSpec((10, Cout, S), lambda n: (0, 0, 0)),    # pool-folded fc weight
            pl.BlockSpec((1, 10), lambda n: (0, 0)),             # fc bias
        ],
        out_specs=pl.BlockSpec((B, 10), lambda n: (n, 0)),
        compiler_params=pltpu.CompilerParams(
            dimension_semantics=("parallel",),
            vmem_limit_bytes=32 * 1024 * 1024),
    )(p, cwb, g, fb)
    return out[:N]                                               # (N, 10)


# ------------------------------- reference ---------------------------------

def reference_forward(x, conv_w, conv_b, fc_w, fc_b):
    """Pure JAX/numpy reference with PyTorch semantics (NCHW)."""
    y = lax.conv_general_dilated(x, conv_w, (1, 1), "VALID",
                                 dimension_numbers=("NCHW", "OIHW", "NCHW"))
    y = jnp.maximum(y + conv_b.reshape(1, -1, 1, 1), 0.0)                   # (N,32,14,14)
    y = np.asarray(y)
    N, C, Hc, Wc = y.shape
    pooled = np.zeros((N, C, 13, 13), np.float32)
    for i in range(13):
        hs, he = (i * Hc) // 13, -((-(i + 1) * Hc) // 13)
        for j in range(13):
            ws, we = (j * Wc) // 13, -((-(j + 1) * Wc) // 13)
            pooled[:, :, i, j] = y[:, :, hs:he, ws:we].mean(axis=(2, 3))
    flat = pooled.reshape(N, -1)                                            # NCHW flatten
    return flat @ np.asarray(fc_w).T + np.asarray(fc_b)


if __name__ == "__main__":
    key = jax.random.PRNGKey(0)
    k1, k2, k3, k4, k5 = jax.random.split(key, 5)

    N, Cin, H, W = 2, 3, 16, 16
    Cout, K = 32, 3

    x = jax.random.normal(k1, (N, Cin, H, W), jnp.float32)
    conv_w = jax.random.normal(k2, (Cout, Cin, K, K), jnp.float32) * 0.1
    conv_b = jax.random.normal(k3, (Cout,), jnp.float32) * 0.1
    fc_w = jax.random.normal(k4, (10, Cout * 13 * 13), jnp.float32) * 0.01
    fc_b = jax.random.normal(k5, (10,), jnp.float32) * 0.1

    params = prepare_params(conv_w, conv_b, fc_w, fc_b)     # one-time, hoisted
    out = jax.block_until_ready(simple_cnn_forward(x, *params))
    assert out.shape == (N, 10) and out.dtype == jnp.float32

    ref = reference_forward(x, conv_w, conv_b, fc_w, fc_b)
    np.testing.assert_allclose(np.asarray(out), np.asarray(ref), rtol=1e-3, atol=1e-3)

    print("KERNEL_OK")
</pallas_src>

<mosaic_0001>
module attributes {stable_mosaic.version = 11 : i64} {
  func.func @simple_cnn_kernel(%arg0: i32, %arg1: memref<2x28x196xf32, #tpu.memory_space<vmem>>, %arg2: memref<32x28xf32, #tpu.memory_space<vmem>>, %arg3: memref<10x32x196xf32, #tpu.memory_space<vmem>>, %arg4: memref<1x10xf32, #tpu.memory_space<vmem>>, %arg5: memref<2x10xf32, #tpu.memory_space<vmem>>) attributes {dimension_semantics = [#tpu.dimension_semantics<parallel>], iteration_bounds = array<i64: 1>, scalar_prefetch = 0 : i64, scratch_operands = 0 : i64, tpu.core_type = #tpu.core_type<tc>, window_params = [{transform_indices = @transform_0, window_bounds = array<i64: 2, 28, 196>}, {pipeline_mode = #tpu.pipeline_mode<synchronous>, transform_indices = @transform_1, window_bounds = array<i64: 32, 28>}, {pipeline_mode = #tpu.pipeline_mode<synchronous>, transform_indices = @transform_2, window_bounds = array<i64: 10, 32, 196>}, {pipeline_mode = #tpu.pipeline_mode<synchronous>, transform_indices = @transform_3, window_bounds = array<i64: 1, 10>}, {transform_indices = @transform_4, window_bounds = array<i64: 2, 10>}]} {
    %c0 = arith.constant 0 : index
    %c0_0 = arith.constant 0 : index
    %0 = vector.load %arg2[%c0, %c0_0] : memref<32x28xf32, #tpu.memory_space<vmem>>, vector<32x28xf32>
    %1 = vector.shape_cast %0 : vector<32x28xf32> to vector<1x32x28xf32>
    %2 = vector.shape_cast %1 : vector<1x32x28xf32> to vector<1x32x28xf32>
    %3 = vector.broadcast %2 : vector<1x32x28xf32> to vector<2x32x28xf32>
    %c0_1 = arith.constant 0 : index
    %c0_2 = arith.constant 0 : index
    %c0_3 = arith.constant 0 : index
    %4 = vector.load %arg1[%c0_1, %c0_2, %c0_3] : memref<2x28x196xf32, #tpu.memory_space<vmem>>, vector<2x28x196xf32>
    "tpu.trace_start"() <{level = 10 : i32, message = "bck,bks->bcs"}> : () -> ()
    %cst = arith.constant dense<0.000000e+00> : vector<2x32x196xf32>
    %5 = tpu.matmul %3, %4, %cst {dimension_numbers = #tpu.dot_dimension_numbers<[2], [1], [1], [2], [0, 0, 0, 1, 1, 2], [0], [0]>} : vector<2x32x28xf32>, vector<2x28x196xf32>, vector<2x32x196xf32> -> vector<2x32x196xf32>
    "tpu.trace_stop"() : () -> ()
    %cst_4 = arith.constant 0.000000e+00 : f32
    %6 = vector.broadcast %cst_4 : f32 to vector<2x32x196xf32>
    %7 = arith.maximumf %5, %6 : vector<2x32x196xf32>
    %8 = tpu.iota {dimensions = array<i32: 1>} : vector<1x10xi32>
    %cst_5 = arith.constant 0.000000e+00 : f32
    %9 = vector.broadcast %cst_5 : f32 to vector<2x10xf32>
    %c0_6 = arith.constant 0 : index
    %c0_7 = arith.constant 0 : index
    %c0_8 = arith.constant 0 : index
    %10 = vector.load %arg3[%c0_6, %c0_7, %c0_8] : memref<10x32x196xf32, #tpu.memory_space<vmem>>, vector<1x32x196xf32>
    %11 = vector.shape_cast %10 : vector<1x32x196xf32> to vector<32x196xf32>
    %12 = vector.shape_cast %11 : vector<32x196xf32> to vector<1x32x196xf32>
    %13 = vector.broadcast %12 : vector<1x32x196xf32> to vector<2x32x196xf32>
    %14 = arith.mulf %7, %13 : vector<2x32x196xf32>
    %cst_9 = arith.constant dense<0.000000e+00> : vector<2x32xf32>
    %15 = vector.multi_reduction <add>, %14, %cst_9 [2] : vector<2x32x196xf32> to vector<2x32xf32>
    %cst_10 = arith.constant dense<0.000000e+00> : vector<2xf32>
    %16 = vector.multi_reduction <add>, %15, %cst_10 [1] : vector<2x32xf32> to vector<2xf32>
    %17 = vector.shape_cast %16 : vector<2xf32> to vector<2x1xf32>
    %c0_i32 = arith.constant 0 : i32
    %18 = vector.broadcast %c0_i32 : i32 to vector<1x10xi32>
    %19 = arith.cmpi eq, %8, %18 : vector<1x10xi32>
    %cst_11 = arith.constant 0.000000e+00 : f32
    %20 = vector.shape_cast %19 : vector<1x10xi1> to vector<1x10xi1>
    %21 = vector.broadcast %20 : vector<1x10xi1> to vector<2x10xi1>
    %22 = vector.shape_cast %17 : vector<2x1xf32> to vector<2x1xf32>
    %23 = vector.broadcast %22 : vector<2x1xf32> to vector<2x10xf32>
    %24 = vector.broadcast %cst_11 : f32 to vector<2x10xf32>
    %25 = arith.select %21, %23, %24 : vector<2x10xi1>, vector<2x10xf32>
    %26 = arith.addf %9, %25 : vector<2x10xf32>
    %c1 = arith.constant 1 : index
    %c0_12 = arith.constant 0 : index
    %c0_13 = arith.constant 0 : index
    %27 = vector.load %arg3[%c1, %c0_12, %c0_13] : memref<10x32x196xf32, #tpu.memory_space<vmem>>, vector<1x32x196xf32>
    %28 = vector.shape_cast %27 : vector<1x32x196xf32> to vector<32x196xf32>
    %29 = vector.shape_cast %28 : vector<32x196xf32> to vector<1x32x196xf32>
    %30 = vector.broadcast %29 : vector<1x32x196xf32> to vector<2x32x196xf32>
    %31 = arith.mulf %7, %30 : vector<2x32x196xf32>
    %cst_14 = arith.constant dense<0.000000e+00> : vector<2x32xf32>
    %32 = vector.multi_reduction <add>, %31, %cst_14 [2] : vector<2x32x196xf32> to vector<2x32xf32>
    %cst_15 = arith.constant dense<0.000000e+00> : vector<2xf32>
    %33 = vector.multi_reduction <add>, %32, %cst_15 [1] : vector<2x32xf32> to vector<2xf32>
    %34 = vector.shape_cast %33 : vector<2xf32> to vector<2x1xf32>
    %c1_i32 = arith.constant 1 : i32
    %35 = vector.broadcast %c1_i32 : i32 to vector<1x10xi32>
    %36 = arith.cmpi eq, %8, %35 : vector<1x10xi32>
    %cst_16 = arith.constant 0.000000e+00 : f32
    %37 = vector.shape_cast %36 : vector<1x10xi1> to vector<1x10xi1>
    %38 = vector.broadcast %37 : vector<1x10xi1> to vector<2x10xi1>
    %39 = vector.shape_cast %34 : vector<2x1xf32> to vector<2x1xf32>
    %40 = vector.broadcast %39 : vector<2x1xf32> to vector<2x10xf32>
    %41 = vector.broadcast %cst_16 : f32 to vector<2x10xf32>
    %42 = arith.select %38, %40, %41 : vector<2x10xi1>, vector<2x10xf32>
    %43 = arith.addf %26, %42 : vector<2x10xf32>
    %c2 = arith.constant 2 : index
    %c0_17 = arith.constant 0 : index
    %c0_18 = arith.constant 0 : index
    %44 = vector.load %arg3[%c2, %c0_17, %c0_18] : memref<10x32x196xf32, #tpu.memory_space<vmem>>, vector<1x32x196xf32>
    %45 = vector.shape_cast %44 : vector<1x32x196xf32> to vector<32x196xf32>
    %46 = vector.shape_cast %45 : vector<32x196xf32> to vector<1x32x196xf32>
    %47 = vector.broadcast %46 : vector<1x32x196xf32> to vector<2x32x196xf32>
    %48 = arith.mulf %7, %47 : vector<2x32x196xf32>
    %cst_19 = arith.constant dense<0.000000e+00> : vector<2x32xf32>
    %49 = vector.multi_reduction <add>, %48, %cst_19 [2] : vector<2x32x196xf32> to vector<2x32xf32>
    %cst_20 = arith.constant dense<0.000000e+00> : vector<2xf32>
    %50 = vector.multi_reduction <add>, %49, %cst_20 [1] : vector<2x32xf32> to vector<2xf32>
    %51 = vector.shape_cast %50 : vector<2xf32> to vector<2x1xf32>
    %c2_i32 = arith.constant 2 : i32
    %52 = vector.broadcast %c2_i32 : i32 to vector<1x10xi32>
    %53 = arith.cmpi eq, %8, %52 : vector<1x10xi32>
    %cst_21 = arith.constant 0.000000e+00 : f32
    %54 = vector.shape_cast %53 : vector<1x10xi1> to vector<1x10xi1>
    %55 = vector.broadcast %54 : vector<1x10xi1> to vector<2x10xi1>
    %56 = vector.shape_cast %51 : vector<2x1xf32> to vector<2x1xf32>
    %57 = vector.broadcast %56 : vector<2x1xf32> to vector<2x10xf32>
    %58 = vector.broadcast %cst_21 : f32 to vector<2x10xf32>
    %59 = arith.select %55, %57, %58 : vector<2x10xi1>, vector<2x10xf32>
    %60 = arith.addf %43, %59 : vector<2x10xf32>
    %c3 = arith.constant 3 : index
    %c0_22 = arith.constant 0 : index
    %c0_23 = arith.constant 0 : index
    %61 = vector.load %arg3[%c3, %c0_22, %c0_23] : memref<10x32x196xf32, #tpu.memory_space<vmem>>, vector<1x32x196xf32>
    %62 = vector.shape_cast %61 : vector<1x32x196xf32> to vector<32x196xf32>
    %63 = vector.shape_cast %62 : vector<32x196xf32> to vector<1x32x196xf32>
    %64 = vector.broadcast %63 : vector<1x32x196xf32> to vector<2x32x196xf32>
    %65 = arith.mulf %7, %64 : vector<2x32x196xf32>
    %cst_24 = arith.constant dense<0.000000e+00> : vector<2x32xf32>
    %66 = vector.multi_reduction <add>, %65, %cst_24 [2] : vector<2x32x196xf32> to vector<2x32xf32>
    %cst_25 = arith.constant dense<0.000000e+00> : vector<2xf32>
    %67 = vector.multi_reduction <add>, %66, %cst_25 [1] : vector<2x32xf32> to vector<2xf32>
    %68 = vector.shape_cast %67 : vector<2xf32> to vector<2x1xf32>
    %c3_i32 = arith.constant 3 : i32
    %69 = vector.broadcast %c3_i32 : i32 to vector<1x10xi32>
    %70 = arith.cmpi eq, %8, %69 : vector<1x10xi32>
    %cst_26 = arith.constant 0.000000e+00 : f32
    %71 = vector.shape_cast %70 : vector<1x10xi1> to vector<1x10xi1>
    %72 = vector.broadcast %71 : vector<1x10xi1> to vector<2x10xi1>
    %73 = vector.shape_cast %68 : vector<2x1xf32> to vector<2x1xf32>
    %74 = vector.broadcast %73 : vector<2x1xf32> to vector<2x10xf32>
    %75 = vector.broadcast %cst_26 : f32 to vector<2x10xf32>
    %76 = arith.select %72, %74, %75 : vector<2x10xi1>, vector<2x10xf32>
    %77 = arith.addf %60, %76 : vector<2x10xf32>
    %c4 = arith.constant 4 : index
    %c0_27 = arith.constant 0 : index
    %c0_28 = arith.constant 0 : index
    %78 = vector.load %arg3[%c4, %c0_27, %c0_28] : memref<10x32x196xf32, #tpu.memory_space<vmem>>, vector<1x32x196xf32>
    %79 = vector.shape_cast %78 : vector<1x32x196xf32> to vector<32x196xf32>
    %80 = vector.shape_cast %79 : vector<32x196xf32> to vector<1x32x196xf32>
    %81 = vector.broadcast %80 : vector<1x32x196xf32> to vector<2x32x196xf32>
    %82 = arith.mulf %7, %81 : vector<2x32x196xf32>
    %cst_29 = arith.constant dense<0.000000e+00> : vector<2x32xf32>
    %83 = vector.multi_reduction <add>, %82, %cst_29 [2] : vector<2x32x196xf32> to vector<2x32xf32>
    %cst_30 = arith.constant dense<0.000000e+00> : vector<2xf32>
    %84 = vector.multi_reduction <add>, %83, %cst_30 [1] : vector<2x32xf32> to vector<2xf32>
    %85 = vector.shape_cast %84 : vector<2xf32> to vector<2x1xf32>
    %c4_i32 = arith.constant 4 : i32
    %86 = vector.broadcast %c4_i32 : i32 to vector<1x10xi32>
    %87 = arith.cmpi eq, %8, %86 : vector<1x10xi32>
    %cst_31 = arith.constant 0.000000e+00 : f32
    %88 = vector.shape_cast %87 : vector<1x10xi1> to vector<1x10xi1>
    %89 = vector.broadcast %88 : vector<1x10xi1> to vector<2x10xi1>
    %90 = vector.shape_cast %85 : vector<2x1xf32> to vector<2x1xf32>
    %91 = vector.broadcast %90 : vector<2x1xf32> to vector<2x10xf32>
    %92 = vector.broadcast %cst_31 : f32 to vector<2x10xf32>
    %93 = arith.select %89, %91, %92 : vector<2x10xi1>, vector<2x10xf32>
    %94 = arith.addf %77, %93 : vector<2x10xf32>
    %c5 = arith.constant 5 : index
    %c0_32 = arith.constant 0 : index
    %c0_33 = arith.constant 0 : index
    %95 = vector.load %arg3[%c5, %c0_32, %c0_33] : memref<10x32x196xf32, #tpu.memory_space<vmem>>, vector<1x32x196xf32>
    %96 = vector.shape_cast %95 : vector<1x32x196xf32> to vector<32x196xf32>
    %97 = vector.shape_cast %96 : vector<32x196xf32> to vector<1x32x196xf32>
    %98 = vector.broadcast %97 : vector<1x32x196xf32> to vector<2x32x196xf32>
    %99 = arith.mulf %7, %98 : vector<2x32x196xf32>
    %cst_34 = arith.constant dense<0.000000e+00> : vector<2x32xf32>
    %100 = vector.multi_reduction <add>, %99, %cst_34 [2] : vector<2x32x196xf32> to vector<2x32xf32>
    %cst_35 = arith.constant dense<0.000000e+00> : vector<2xf32>
    %101 = vector.multi_reduction <add>, %100, %cst_35 [1] : vector<2x32xf32> to vector<2xf32>
    %102 = vector.shape_cast %101 : vector<2xf32> to vector<2x1xf32>
    %c5_i32 = arith.constant 5 : i32
    %103 = vector.broadcast %c5_i32 : i32 to vector<1x10xi32>
    %104 = arith.cmpi eq, %8, %103 : vector<1x10xi32>
    %cst_36 = arith.constant 0.000000e+00 : f32
    %105 = vector.shape_cast %104 : vector<1x10xi1> to vector<1x10xi1>
    %106 = vector.broadcast %105 : vector<1x10xi1> to vector<2x10xi1>
    %107 = vector.shape_cast %102 : vector<2x1xf32> to vector<2x1xf32>
    %108 = vector.broadcast %107 : vector<2x1xf32> to vector<2x10xf32>
    %109 = vector.broadcast %cst_36 : f32 to vector<2x10xf32>
    %110 = arith.select %106, %108, %109 : vector<2x10xi1>, vector<2x10xf32>
    %111 = arith.addf %94, %110 : vector<2x10xf32>
    %c6 = arith.constant 6 : index
    %c0_37 = arith.constant 0 : index
    %c0_38 = arith.constant 0 : index
    %112 = vector.load %arg3[%c6, %c0_37, %c0_38] : memref<10x32x196xf32, #tpu.memory_space<vmem>>, vector<1x32x196xf32>
    %113 = vector.shape_cast %112 : vector<1x32x196xf32> to vector<32x196xf32>
    %114 = vector.shape_cast %113 : vector<32x196xf32> to vector<1x32x196xf32>
    %115 = vector.broadcast %114 : vector<1x32x196xf32> to vector<2x32x196xf32>
    %116 = arith.mulf %7, %115 : vector<2x32x196xf32>
    %cst_39 = arith.constant dense<0.000000e+00> : vector<2x32xf32>
    %117 = vector.multi_reduction <add>, %116, %cst_39 [2] : vector<2x32x196xf32> to vector<2x32xf32>
    %cst_40 = arith.constant dense<0.000000e+00> : vector<2xf32>
    %118 = vector.multi_reduction <add>, %117, %cst_40 [1] : vector<2x32xf32> to vector<2xf32>
    %119 = vector.shape_cast %118 : vector<2xf32> to vector<2x1xf32>
    %c6_i32 = arith.constant 6 : i32
    %120 = vector.broadcast %c6_i32 : i32 to vector<1x10xi32>
    %121 = arith.cmpi eq, %8, %120 : vector<1x10xi32>
    %cst_41 = arith.constant 0.000000e+00 : f32
    %122 = vector.shape_cast %121 : vector<1x10xi1> to vector<1x10xi1>
    %123 = vector.broadcast %122 : vector<1x10xi1> to vector<2x10xi1>
    %124 = vector.shape_cast %119 : vector<2x1xf32> to vector<2x1xf32>
    %125 = vector.broadcast %124 : vector<2x1xf32> to vector<2x10xf32>
    %126 = vector.broadcast %cst_41 : f32 to vector<2x10xf32>
    %127 = arith.select %123, %125, %126 : vector<2x10xi1>, vector<2x10xf32>
    %128 = arith.addf %111, %127 : vector<2x10xf32>
    %c7 = arith.constant 7 : index
    %c0_42 = arith.constant 0 : index
    %c0_43 = arith.constant 0 : index
    %129 = vector.load %arg3[%c7, %c0_42, %c0_43] : memref<10x32x196xf32, #tpu.memory_space<vmem>>, vector<1x32x196xf32>
    %130 = vector.shape_cast %129 : vector<1x32x196xf32> to vector<32x196xf32>
    %131 = vector.shape_cast %130 : vector<32x196xf32> to vector<1x32x196xf32>
    %132 = vector.broadcast %131 : vector<1x32x196xf32> to vector<2x32x196xf32>
    %133 = arith.mulf %7, %132 : vector<2x32x196xf32>
    %cst_44 = arith.constant dense<0.000000e+00> : vector<2x32xf32>
    %134 = vector.multi_reduction <add>, %133, %cst_44 [2] : vector<2x32x196xf32> to vector<2x32xf32>
    %cst_45 = arith.constant dense<0.000000e+00> : vector<2xf32>
    %135 = vector.multi_reduction <add>, %134, %cst_45 [1] : vector<2x32xf32> to vector<2xf32>
    %136 = vector.shape_cast %135 : vector<2xf32> to vector<2x1xf32>
    %c7_i32 = arith.constant 7 : i32
    %137 = vector.broadcast %c7_i32 : i32 to vector<1x10xi32>
    %138 = arith.cmpi eq, %8, %137 : vector<1x10xi32>
    %cst_46 = arith.constant 0.000000e+00 : f32
    %139 = vector.shape_cast %138 : vector<1x10xi1> to vector<1x10xi1>
    %140 = vector.broadcast %139 : vector<1x10xi1> to vector<2x10xi1>
    %141 = vector.shape_cast %136 : vector<2x1xf32> to vector<2x1xf32>
    %142 = vector.broadcast %141 : vector<2x1xf32> to vector<2x10xf32>
    %143 = vector.broadcast %cst_46 : f32 to vector<2x10xf32>
    %144 = arith.select %140, %142, %143 : vector<2x10xi1>, vector<2x10xf32>
    %145 = arith.addf %128, %144 : vector<2x10xf32>
    %c8 = arith.constant 8 : index
    %c0_47 = arith.constant 0 : index
    %c0_48 = arith.constant 0 : index
    %146 = vector.load %arg3[%c8, %c0_47, %c0_48] : memref<10x32x196xf32, #tpu.memory_space<vmem>>, vector<1x32x196xf32>
    %147 = vector.shape_cast %146 : vector<1x32x196xf32> to vector<32x196xf32>
    %148 = vector.shape_cast %147 : vector<32x196xf32> to vector<1x32x196xf32>
    %149 = vector.broadcast %148 : vector<1x32x196xf32> to vector<2x32x196xf32>
    %150 = arith.mulf %7, %149 : vector<2x32x196xf32>
    %cst_49 = arith.constant dense<0.000000e+00> : vector<2x32xf32>
    %151 = vector.multi_reduction <add>, %150, %cst_49 [2] : vector<2x32x196xf32> to vector<2x32xf32>
    %cst_50 = arith.constant dense<0.000000e+00> : vector<2xf32>
    %152 = vector.multi_reduction <add>, %151, %cst_50 [1] : vector<2x32xf32> to vector<2xf32>
    %153 = vector.shape_cast %152 : vector<2xf32> to vector<2x1xf32>
    %c8_i32 = arith.constant 8 : i32
    %154 = vector.broadcast %c8_i32 : i32 to vector<1x10xi32>
    %155 = arith.cmpi eq, %8, %154 : vector<1x10xi32>
    %cst_51 = arith.constant 0.000000e+00 : f32
    %156 = vector.shape_cast %155 : vector<1x10xi1> to vector<1x10xi1>
    %157 = vector.broadcast %156 : vector<1x10xi1> to vector<2x10xi1>
    %158 = vector.shape_cast %153 : vector<2x1xf32> to vector<2x1xf32>
    %159 = vector.broadcast %158 : vector<2x1xf32> to vector<2x10xf32>
    %160 = vector.broadcast %cst_51 : f32 to vector<2x10xf32>
    %161 = arith.select %157, %159, %160 : vector<2x10xi1>, vector<2x10xf32>
    %162 = arith.addf %145, %161 : vector<2x10xf32>
    %c9 = arith.constant 9 : index
    %c0_52 = arith.constant 0 : index
    %c0_53 = arith.constant 0 : index
    %163 = vector.load %arg3[%c9, %c0_52, %c0_53] : memref<10x32x196xf32, #tpu.memory_space<vmem>>, vector<1x32x196xf32>
    %164 = vector.shape_cast %163 : vector<1x32x196xf32> to vector<32x196xf32>
    %165 = vector.shape_cast %164 : vector<32x196xf32> to vector<1x32x196xf32>
    %166 = vector.broadcast %165 : vector<1x32x196xf32> to vector<2x32x196xf32>
    %167 = arith.mulf %7, %166 : vector<2x32x196xf32>
    %cst_54 = arith.constant dense<0.000000e+00> : vector<2x32xf32>
    %168 = vector.multi_reduction <add>, %167, %cst_54 [2] : vector<2x32x196xf32> to vector<2x32xf32>
    %cst_55 = arith.constant dense<0.000000e+00> : vector<2xf32>
    %169 = vector.multi_reduction <add>, %168, %cst_55 [1] : vector<2x32xf32> to vector<2xf32>
    %170 = vector.shape_cast %169 : vector<2xf32> to vector<2x1xf32>
    %c9_i32 = arith.constant 9 : i32
    %171 = vector.broadcast %c9_i32 : i32 to vector<1x10xi32>
    %172 = arith.cmpi eq, %8, %171 : vector<1x10xi32>
    %cst_56 = arith.constant 0.000000e+00 : f32
    %173 = vector.shape_cast %172 : vector<1x10xi1> to vector<1x10xi1>
    %174 = vector.broadcast %173 : vector<1x10xi1> to vector<2x10xi1>
    %175 = vector.shape_cast %170 : vector<2x1xf32> to vector<2x1xf32>
    %176 = vector.broadcast %175 : vector<2x1xf32> to vector<2x10xf32>
    %177 = vector.broadcast %cst_56 : f32 to vector<2x10xf32>
    %178 = arith.select %174, %176, %177 : vector<2x10xi1>, vector<2x10xf32>
    %179 = arith.addf %162, %178 : vector<2x10xf32>
    %c0_57 = arith.constant 0 : index
    %c0_58 = arith.constant 0 : index
    %180 = vector.load %arg4[%c0_57, %c0_58] : memref<1x10xf32, #tpu.memory_space<vmem>>, vector<1x10xf32>
    %181 = vector.broadcast %180 : vector<1x10xf32> to vector<2x10xf32>
    %182 = arith.addf %179, %181 : vector<2x10xf32>
    %c0_59 = arith.constant 0 : index
    %c0_60 = arith.constant 0 : index
    %183 = vector.load %arg5[%c0_59, %c0_60] : memref<2x10xf32, #tpu.memory_space<vmem>>, vector<2x10xf32>
    tpu.vector_store %arg5[%c0_59, %c0_60], %182 {strides = array<i32>} : memref<2x10xf32, #tpu.memory_space<vmem>>, vector<2x10xf32>,
    return
  }
  func.func @transform_0(%arg0: i32) -> (i32, i32, i32) {
    %c0_i32 = arith.constant 0 : i32
    %c0_i32_0 = arith.constant 0 : i32
    %c0_i32_1 = arith.constant 0 : i32
    return %arg0, %c0_i32, %c0_i32_0 : i32, i32, i32
  }
  func.func @transform_1(%arg0: i32) -> (i32, i32) {
    %c0_i32 = arith.constant 0 : i32
    %c0_i32_0 = arith.constant 0 : i32
    %c0_i32_1 = arith.constant 0 : i32
    return %c0_i32, %c0_i32_0 : i32, i32
  }
  func.func @transform_2(%arg0: i32) -> (i32, i32, i32) {
    %c0_i32 = arith.constant 0 : i32
    %c0_i32_0 = arith.constant 0 : i32
    %c0_i32_1 = arith.constant 0 : i32
    %c0_i32_2 = arith.constant 0 : i32
    return %c0_i32, %c0_i32_0, %c0_i32_1 : i32, i32, i32
  }
  func.func @transform_3(%arg0: i32) -> (i32, i32) {
    %c0_i32 = arith.constant 0 : i32
    %c0_i32_0 = arith.constant 0 : i32
    %c0_i32_1 = arith.constant 0 : i32
    return %c0_i32, %c0_i32_0 : i32, i32
  }
  func.func @transform_4(%arg0: i32) -> (i32, i32) {
    %c0_i32 = arith.constant 0 : i32
    %c0_i32_0 = arith.constant 0 : i32
    return %arg0, %c0_i32 : i32, i32
  }
}

</mosaic_0001>

<bundles_post_ra>
// kernel: simple_cnn_forward.1
= control target key start
LH: loop header
LB: loop body
LE: loop exit
PB: predicated region body
PF: predicated region fallthrough
CT: control target
= control target key end

     0   :  { %vm51_vm0 = vcmask 1043456   ;;  %s2480_s0 = inlined_call_operand.vmem [shape: f32[2,28,196], index: 0, kind: input, shape index: {}]   ;;  %s2481_s1 = inlined_call_operand.vmem [shape: f32[32,28], index: 1, kind: input, shape index: {}]   ;;  %s2482_s2 = inlined_call_operand.vmem [shape: f32[10,32,196], index: 2, kind: input, shape index: {}]   ;;  %s2483_s3 = inlined_call_operand.vmem [shape: f32[1,10], index: 3, kind: input, shape index: {}]   ;;  %s2484_s4 = inlined_call_operand.hbm [shape: f32[2,10], index: 4, kind: output, shape index: {}]  }
   0x1   :  { %v29_v0 = vld [vmem:[%s2480_s0 + $0x38] sm:$0xf]  ;;  %v27_v2 = vld [vmem:[%s2480_s0 + $0x28] sm:$0xff]  ;;  %v28_v3 = vld [vmem:[%s2480_s0 + $0x30] sm:$0xf] }
   0x2   :  { %v37_v1 = vld [vmem:[%s2480_s0 + $0x78] sm:$0xf]  ;;  %1422 = vmatprep.subr.msk.mxu0 %vm51_vm0, %v29_v0  ;;  %v36_v4 = vld [vmem:[%s2480_s0 + $0x70] sm:$0xf]  ;;  %v35_v5 = vld [vmem:[%s2480_s0 + $0x68] sm:$0xff] }
   0x3   :  { %1428 = vmatprep.subr.msk.mxu1 %vm51_vm0, %v37_v1  ;;  %1423 = vmatpush1.msk.msra.mxu0 %vm51_vm0, %v28_v3  ;;  %v26_v6 = vld [vmem:[%s2480_s0 + $0x20] sm:$0xff]  ;;  %v25_v8 = vld [vmem:[%s2480_s0 + $0x18] sm:$0xff]  ;;  %v24_v10 = vld [vmem:[%s2480_s0 + $0x10] sm:$0xff] }
   0x4   :  { %1429 = vmatpush1.msk.msra.mxu1 %vm51_vm0, %v36_v4  ;;  %v34_v7 = vld [vmem:[%s2480_s0 + $0x60] sm:$0xff]  ;;  %84 = vmatprep.subr.mxu0 %v27_v2  ;;  %v33_v9 = vld [vmem:[%s2480_s0 + $0x58] sm:$0xff]  ;;  %v32_v11 = vld [vmem:[%s2480_s0 + $0x50] sm:$0xff] }
   0x5   :  { %179 = vmatprep.subr.mxu1 %v35_v5  ;;  %85 = vmatpush1.msra.mxu0 %v26_v6  ;;  %v23_v12 = vld [vmem:[%s2480_s0 + $0x8] sm:$0xff]  ;;  %v22_v14 = vld [vmem:[%s2480_s0] sm:$0xff] }
   0x6   :  { %180 = vmatpush1.msra.mxu1 %v34_v7  ;;  %v31_v13 = vld [vmem:[%s2480_s0 + $0x48] sm:$0xff]  ;;  %86 = vmatprep.subr.mxu0 %v25_v8  ;;  %v30_v15 = vld [vmem:[%s2480_s0 + $0x40] sm:$0xff] }
   0x7   :  { %181 = vmatprep.subr.mxu1 %v33_v9  ;;  %87 = vmatpush1.msra.mxu0 %v24_v10 }
   0x8   :  { %182 = vmatpush1.msra.mxu1 %v32_v11 }
   0x9   :  { %9 = vsyncpa [#allocation3], 0  ;;  %88 = vmatprep.subr.mxu0 %v23_v12  ;;  %183 = vmatprep.subr.mxu1 %v31_v13  ;;  %v18_v16 = vld [vmem:[%s2481_s1] sm:$0xff]  ;;  %vm38_vm1 = vcmask 228352   ;;  %v1531_v17 = vmov 0.0   ;;  %v19_v18 = vld [vmem:[%s2481_s1 + $0x8] sm:$0xff] }
   0xa   :  { %89 = vmatpush1.msra.mxu0 %v22_v14  ;;  %122 = vmatprep.mubr.f32.mxu0 %v1531_v17  ;;  %v20_v19 = vld [vmem:[%s2481_s1 + $0x10] sm:$0xff]  ;;  %v21_v20 = vld [vmem:[%s2481_s1 + $0x18] sm:$0xff]  ;;  %v261_v26 = vld [vmem:[%s2482_s2 + $0x8] sm:$0xff]  ;;  %vm284_vm2 = vcmask 556032   ;;  %vm334_vm3 = vcmask 130112   ;;  %vm341_vm4 = vcmask 195712  }
   0xb   :  { %184 = vmatpush1.msra.mxu1 %v30_v15  ;;  %217 = vmatprep.mubr.f32.mxu1 %v1531_v17  ;;  %v260_v29 = vld [vmem:[%s2482_s2] sm:$0xff]  ;;  %v1648_v39 = vld [vmem:[%s2482_s2 + $0x18] sm:$0xff]  ;;  %v1435_v40 = vld [vmem:[%s2482_s2 + $0x48] sm:$0xff]  ;;  %vm348_vm5 = vcmask 261312   ;;  %vm369_vm6 = vcmask 1041409   ;;  %vm372_vm7 = vcmask 254976  }
   0xc   :  { %1424 = vmatmul.mubr.msk.f32.vlgmr.msra.gmra.mxu0 %vm38_vm1, %v18_v16  ;;  %1430 = vmatmul.mubr.msk.f32.vlgmr.msra.gmra.mxu1 %vm38_vm1, %v18_v16  ;;  %v1437_v41 = vld [vmem:[%s2482_s2 + $0x58] sm:$0xff]  ;;  %v1664_v45 = vld [vmem:[%s2482_s2 + $0x10] sm:$0xff]  ;;  %v1434_v55 = vld [vmem:[%s2482_s2 + $0x40] sm:$0xff]  ;;  %s1532_s22 = smov [#allocation2]  }
   0xd   :  { %223 = vmatprep.mubr.f32.mxu1 %v1531_v17  ;;  %128 = vmatprep.mubr.f32.mxu0 %v1531_v17  ;;  %v1436_v56 = vld [vmem:[%s2482_s2 + $0x50] sm:$0xff]  ;;  %v1443_v1 = vld [vmem:[%s2482_s2 + $0x88] sm:$0xff]  ;;  %v1445_v2 = vld [vmem:[%s2482_s2 + $0x98] sm:$0xff]  ;;  %s1414_s0 = sshll.u32 %s1532_s22, 4  ;;  %s1415_s0 = int_to_ptr.vmem [resolvable:$true] %s1414_s0 }
   0xe   :  { %v1442_v11 = vld [vmem:[%s2482_s2 + $0x80] sm:$0xff]  ;;  %v1444_v13 = vld [vmem:[%s2482_s2 + $0x90] sm:$0xff]  ;;  %s1509_s23 = scalar_lea.vmem %s1415_s0, 32  ;;  %p1514_p1 = scmp.lt.s32.totalorder %s1415_s0, %s1415_s0 }
   0xf   :  { %p1510_p0 = scmp.ne.s32.totalorder %s1415_s0, %s1509_s23  ;;  %p1515_p2 = scmp.lt.s32.totalorder %s1509_s23, %s1509_s23 }
  0x10   :  { %1431 = vmatmul.mubr.msk.f32.gmra.mxu1 %vm38_vm1, %v19_v18  ;;  %1425 = vmatmul.mubr.msk.f32.gmra.mxu0 %vm38_vm1, %v19_v18 }
  0x11   :  { %134 = vmatprep.mubr.f32.mxu0 %v1531_v17  ;;  %229 = vmatprep.mubr.f32.mxu1 %v1531_v17  ;;  %p1516_p3 = por %p1515_p2, %p1514_p1 }
  0x13   :  { %p1517_p4 = pnand %p1516_p3, %p1510_p0 }
  0x14   :  { %1426 = vmatmul.mubr.msk.f32.gmra.mxu0 %vm38_vm1, %v20_v19  ;;  %1432 = vmatmul.mubr.msk.f32.gmra.mxu1 %vm38_vm1, %v20_v19 }
  0x15   :  { %140 = vmatprep.mubr.f32.mxu0 %v1531_v17  ;;  %235 = vmatprep.mubr.f32.mxu1 %v1531_v17 }
  0x18   :  { %1427 = vmatmul.mubr.msk.f32.gmra.mxu0 %vm38_vm1, %v21_v20  ;;  %1433 = vmatmul.mubr.msk.f32.gmra.mxu1 %vm38_vm1, %v21_v20 }
  0xcc   :  { %v124_v21 = vpop.f32.mrf.mxu0  ;;  %v219_v22 = vpop.f32.mrf.mxu1 }
  0xcd   :  { %v1626_v23 = vmax.f32 %v124_v21, 0.0  ;;  %v1641_v35 = vmax.f32 %v219_v22, 0.0  ;;  %v1451_v21 = vld [vmem:[%s2482_s2 + $0xc8] sm:$0xff]  ;;  %v1453_v22 = vld [vmem:[%s2482_s2 + $0xd8] sm:$0xff] }
  0xce   :  { %v126_v24 = vpop.f32.mrf.mxu0  ;;  %v221_v25 = vpop.f32.mrf.mxu1 }
  0xcf   :  { %v1631_v27 = vmax.f32 %v126_v24, 0.0  ;;  %v1633_v28 = vmax.f32 %v221_v25, 0.0  ;;  %v268_v32 = vmul.f32 %v260_v29, %v1626_v23  ;;  %v276_v53 = vmul.f32 %v260_v29, %v1641_v35 }
  0xd0   :  { %v225_v30 = vpop.f32.mrf.mxu1  ;;  %v130_v31 = vpop.f32.mrf.mxu0  ;;  %v390_v59 = vmul.f32 %v1434_v55, %v1626_v23  ;;  %v398_v9 = vmul.f32 %v1434_v55, %v1641_v35  ;;  %v503_v12 = vmul.f32 %v1442_v11, %v1626_v23  ;;  %v511_v29 = vmul.f32 %v1442_v11, %v1641_v35 }
  0xd1   :  { %v269_v33 = vmul.f32 %v261_v26, %v1631_v27  ;;  %v277_v34 = vmul.f32 %v261_v26, %v1633_v28  ;;  %v1643_v36 = vmax.f32 %v225_v30, 0.0  ;;  %v1666_v46 = vmax.f32 %v130_v31, 0.0 }
  0xd2   :  { %v227_v37 = vpop.f32.mrf.mxu1  ;;  %v132_v38 = vpop.f32.mrf.mxu0  ;;  %v391_v50 = vmul.f32 %v1435_v40, %v1631_v27  ;;  %v399_v63 = vmul.f32 %v1435_v40, %v1633_v28  ;;  %v504_v7 = vmul.f32 %v1443_v1, %v1631_v27  ;;  %v512_v17 = vmul.f32 %v1443_v1, %v1633_v28  ;;  %v1450_v40 = vld [vmem:[%s2482_s2 + $0xc0] sm:$0xff] }
  0xd3   :  { %v1656_v42 = vmax.f32 %v227_v37, 0.0  ;;  %v1658_v43 = vmax.f32 %v132_v38, 0.0  ;;  %v285_v44 = vsel %vm284_vm2, %v269_v33, 0.0  ;;  %v301_v49 = vsel %vm284_vm2, %v277_v34, 0.0  ;;  %v1459_v33 = vld [vmem:[%s2482_s2 + $0x108] sm:$0xff]  ;;  %v1461_v37 = vld [vmem:[%s2482_s2 + $0x118] sm:$0xff] }
  0xd4   :  { %v286_v47 = vadd.f32 %v285_v44, %v268_v32  ;;  %v278_v52 = vmul.f32 %v1664_v45, %v1643_v36  ;;  %v302_v58 = vadd.f32 %v301_v49, %v276_v53  ;;  %v392_v60 = vmul.f32 %v1436_v56, %v1666_v46 }
  0xd5   :  { %v279_v48 = vmul.f32 %v1648_v39, %v1656_v42  ;;  %v393_v51 = vmul.f32 %v1437_v41, %v1658_v43  ;;  %v406_v61 = vsel %vm284_vm2, %v391_v50, 0.0  ;;  %v401_v0 = vmul.f32 %v1437_v41, %v1656_v42  ;;  %v1452_v41 = vld [vmem:[%s2482_s2 + $0xd0] sm:$0xff] }
  0xd6   :  { %287 = vadd.xlane.f32.xlu0 %v286_v47  ;;  %v407_v3 = vadd.f32 %v406_v61, %v390_v59  ;;  %v422_v5 = vsel %vm284_vm2, %v399_v63, 0.0  ;;  %v506_v8 = vmul.f32 %v1445_v2, %v1658_v43  ;;  %v400_v10 = vmul.f32 %v1436_v56, %v1643_v36  ;;  %v1460_v63 = vld [vmem:[%s2482_s2 + $0x110] sm:$0xff] }
  0xd7   :  { %v305_v54 = vsel %vm284_vm2, %v279_v48, 0.0  ;;  %v410_v62 = vsel %vm284_vm2, %v393_v51, 0.0  ;;  %v426_v6 = vsel %vm284_vm2, %v401_v0, 0.0  ;;  %v423_v14 = vadd.f32 %v422_v5, %v398_v9 }
  0xd8   :  { %v306_v57 = vadd.f32 %v305_v54, %v278_v52  ;;  %v411_v4 = vadd.f32 %v410_v62, %v392_v60  ;;  %v427_v15 = vadd.f32 %v426_v6, %v400_v10  ;;  %v505_v16 = vmul.f32 %v1444_v13, %v1666_v46 }
  0xd9   :  { %v519_v18 = vsel %vm284_vm2, %v504_v7, 0.0  ;;  %v523_v19 = vsel %vm284_vm2, %v506_v8, 0.0  ;;  %v514_v20 = vmul.f32 %v1445_v2, %v1656_v42  ;;  %v535_v26 = vsel %vm284_vm2, %v512_v17, 0.0  ;;  %v1467_v7 = vld [vmem:[%s2482_s2 + $0x148] sm:$0xff] }
  0xda   :  { %307 = vadd.xlane.f32.xlu1 %v306_v57  ;;  %303 = vadd.xlane.f32.xlu0 %v302_v58  ;;  %v520_v24 = vadd.f32 %v519_v18, %v503_v12  ;;  %v524_v25 = vadd.f32 %v523_v19, %v505_v16  ;;  %v617_v31 = vmul.f32 %v1451_v21, %v1631_v27  ;;  %v1458_v57 = vld [vmem:[%s2482_s2 + $0x100] sm:$0xff]  ;;  %v1784_v18 = vld [vmem:[%s2482_s2 + $0x218] sm:$0xff] }
  0xdb   :  { %v539_v30 = vsel %vm284_vm2, %v514_v20, 0.0  ;;  %v619_v32 = vmul.f32 %v1453_v22, %v1658_v43  ;;  %v513_v34 = vmul.f32 %v1444_v13, %v1643_v36  ;;  %v536_v38 = vadd.f32 %v535_v26, %v511_v29  ;;  %v1490_v12 = vld [vmem:[%s2482_s2 + $0x200] sm:$0xff] }
  0xdc   :  { %v625_v44 = vmul.f32 %v1451_v21, %v1633_v28  ;;  %v627_v47 = vmul.f32 %v1453_v22, %v1656_v42  ;;  %v616_v49 = vmul.f32 %v1450_v40, %v1626_v23  ;;  %v618_v50 = vmul.f32 %v1452_v41, %v1666_v46 }
  0xdd   :  { %v540_v48 = vadd.f32 %v539_v30, %v513_v34  ;;  %v730_v51 = vmul.f32 %v1459_v33, %v1631_v27  ;;  %v632_v52 = vsel %vm284_vm2, %v617_v31, 0.0  ;;  %v636_v53 = vsel %vm284_vm2, %v619_v32, 0.0  ;;  %v1498_v32 = vld [vmem:[%s2482_s2 + $0x240] sm:$0xff]  ;;  %v1469_v34 = vld [vmem:[%s2482_s2 + $0x158] sm:$0xff] }
  0xde   :  { %408 = vadd.xlane.f32.xlu0 %v407_v3  ;;  %412 = vadd.xlane.f32.xlu1 %v411_v4  ;;  %v732_v54 = vmul.f32 %v1461_v37, %v1658_v43  ;;  %v738_v55 = vmul.f32 %v1459_v33, %v1633_v28  ;;  %v624_v56 = vmul.f32 %v1450_v40, %v1641_v35  ;;  %v648_v59 = vsel %vm284_vm2, %v625_v44, 0.0  ;;  %v1491_v4 = vld [vmem:[%s2482_s2 + $0x208] sm:$0xff]  ;;  %v1501_v33 = vld [vmem:[%s2482_s2 + $0x258] sm:$0xff]  ;;  %v1468_v44 = vld [vmem:[%s2482_s2 + $0x150] sm:$0xff] }
  0xdf   :  { %v740_v58 = vmul.f32 %v1461_v37, %v1656_v42  ;;  %v626_v60 = vmul.f32 %v1452_v41, %v1643_v36  ;;  %v652_v61 = vsel %vm284_vm2, %v627_v47, 0.0  ;;  %v729_v62 = vmul.f32 %v1458_v57, %v1626_v23  ;;  %v1500_v41 = vld [vmem:[%s2482_s2 + $0x250] sm:$0xff] }
  0xe0   :  { %v633_v0 = vadd.f32 %v632_v52, %v616_v49  ;;  %v637_v1 = vadd.f32 %v636_v53, %v618_v50  ;;  %v745_v2 = vsel %vm284_vm2, %v730_v51, 0.0  ;;  %v731_v3 = vmul.f32 %v1460_v63, %v1666_v46 }
  0xe1   :  { %v749_v5 = vsel %vm284_vm2, %v732_v54, 0.0  ;;  %v761_v6 = vsel %vm284_vm2, %v738_v55, 0.0  ;;  %v649_v8 = vadd.f32 %v648_v59, %v624_v56  ;;  %v653_v9 = vadd.f32 %v652_v61, %v626_v60 }
  0xe2   :  { %424 = vadd.xlane.f32.xlu0 %v423_v14  ;;  %428 = vadd.xlane.f32.xlu1 %v427_v15  ;;  %v737_v10 = vmul.f32 %v1458_v57, %v1641_v35  ;;  %v765_v11 = vsel %vm284_vm2, %v740_v58, 0.0  ;;  %v746_v13 = vadd.f32 %v745_v2, %v729_v62  ;;  %v739_v14 = vmul.f32 %v1460_v63, %v1643_v36  ;;  %v1777_v15 = vld [vmem:[%s2482_s2 + $0x140] sm:$0xff] }
  0xe3   :  { %v1181_v16 = vmul.f32 %v1490_v12, %v1626_v23  ;;  %v1182_v17 = vmul.f32 %v1491_v4, %v1631_v27  ;;  %v750_v19 = vadd.f32 %v749_v5, %v731_v3  ;;  %v842_v21 = vmul.f32 %v1777_v15, %v1626_v23 }
  0xe4   :  { %v762_v20 = vadd.f32 %v761_v6, %v737_v10  ;;  %v843_v22 = vmul.f32 %v1467_v7, %v1631_v27  ;;  %v766_v26 = vadd.f32 %v765_v11, %v739_v14  ;;  %v1189_v30 = vmul.f32 %v1490_v12, %v1641_v35 }
  0xe5   :  { %v1197_v29 = vsel %vm284_vm2, %v1182_v17, 0.0  ;;  %v1190_v31 = vmul.f32 %v1491_v4, %v1633_v28  ;;  %v1294_v40 = vmul.f32 %v1498_v32, %v1626_v23  ;;  %v1296_v50 = vmul.f32 %v1500_v41, %v1666_v46 }
  0xe6   :  { %521 = vadd.xlane.f32.xlu0 %v520_v24  ;;  %525 = vadd.xlane.f32.xlu1 %v524_v25  ;;  %v1792_v24 = vld [vmem:[%s2482_s2 + $0x210] sm:$0xff]  ;;  %v1499_v25 = vld [vmem:[%s2482_s2 + $0x248] sm:$0xff]  ;;  %v1809_v37 = vadd.f32 %v1197_v29, %v1181_v16  ;;  %v844_v51 = vmul.f32 %v1468_v44, %v1666_v46  ;;  %v1297_v54 = vmul.f32 %v1501_v33, %v1658_v43  ;;  %v858_v55 = vsel %vm284_vm2, %v843_v22, 0.0 }
  0xe7   :  { %v1213_v47 = vsel %vm284_vm2, %v1190_v31, 0.0  ;;  %v1295_v49 = vmul.f32 %v1499_v25, %v1631_v27  ;;  %v845_v56 = vmul.f32 %v1469_v34, %v1658_v43  ;;  %v1302_v61 = vmul.f32 %v1498_v32, %v1641_v35 }
  0xe8   :  { %v1826_v52 = vadd.f32 %v1213_v47, %v1189_v30  ;;  %v1314_v60 = vsel %vm284_vm2, %v1297_v54, 0.0  ;;  %v1303_v62 = vmul.f32 %v1499_v25, %v1633_v28  ;;  %v271_v2 = vmul.f32 %v1648_v39, %v1658_v43  ;;  %v1475_v39 = vld [vmem:[%s2482_s2 + $0x188] sm:$0xff] }
  0xe9   :  { %v1310_v58 = vsel %vm284_vm2, %v1295_v49, 0.0  ;;  %v1840_v63 = vadd.f32 %v1314_v60, %v1296_v50  ;;  %v851_v3 = vmul.f32 %v1467_v7, %v1633_v28  ;;  %v853_v4 = vmul.f32 %v1469_v34, %v1656_v42 }
  0xea   :  { %537 = vadd.xlane.f32.xlu0 %v536_v38  ;;  %541 = vadd.xlane.f32.xlu1 %v540_v48  ;;  %v1192_v38 = vmul.f32 %v1784_v18, %v1656_v42  ;;  %v1191_v48 = vmul.f32 %v1792_v24, %v1643_v36  ;;  %v1835_v59 = vadd.f32 %v1310_v58, %v1294_v40  ;;  %v1326_v5 = vsel %vm284_vm2, %v1303_v62, 0.0  ;;  %v1483_v40 = vld [vmem:[%s2482_s2 + $0x1c8] sm:$0xff] }
  0xeb   :  { %v1304_v6 = vmul.f32 %v1500_v41, %v1643_v36  ;;  %v289_v11 = vsel %vm284_vm2, %v271_v2, 0.0  ;;  %v874_v16 = vsel %vm284_vm2, %v851_v3, 0.0  ;;  %v878_v17 = vsel %vm284_vm2, %v853_v4, 0.0  ;;  %v1485_v41 = vld [vmem:[%s2482_s2 + $0x1d8] sm:$0xff] }
  0xec   :  { %v1217_v53 = vsel %vm284_vm2, %v1192_v38, 0.0  ;;  %v850_v22 = vmul.f32 %v1777_v15, %v1641_v35  ;;  %v852_v25 = vmul.f32 %v1468_v44, %v1643_v36  ;;  %v964_v34 = vmul.f32 %v1475_v39, %v1633_v28 }
  0xed   :  { %v1832_v57 = vadd.f32 %v1217_v53, %v1191_v48  ;;  %v1069_v50 = vmul.f32 %v1483_v40, %v1631_v27  ;;  %v1079_v2 = vmul.f32 %v1485_v41, %v1656_v42 }
  0xee   :  { %634 = vadd.xlane.f32.xlu0 %v633_v0  ;;  %638 = vadd.xlane.f32.xlu1 %v637_v1  ;;  %v1305_v0 = vmul.f32 %v1501_v33, %v1656_v42  ;;  %v270_v1 = vmul.f32 %v1664_v45, %v1666_v46  ;;  %v1477_v45 = vld [vmem:[%s2482_s2 + $0x198] sm:$0xff]  ;;  %v875_v29 = vadd.f32 %v874_v16, %v850_v22  ;;  %v987_v48 = vsel %vm284_vm2, %v964_v34, 0.0  ;;  %v1438_v22 = vld [vmem:[%s2482_s2 + $0x60] sm:$0xff] }
  0xef   :  { %v879_v30 = vadd.f32 %v878_v17, %v852_v25  ;;  %v966_v38 = vmul.f32 %v1477_v45, %v1656_v42  ;;  %v1084_v62 = vsel %vm284_vm2, %v1069_v50, 0.0  ;;  %v1183_v42 = vmul.f32 %v1792_v24, %v1666_v46 }
  0xf0   :  { %v1330_v10 = vsel %vm284_vm2, %v1305_v0, 0.0  ;;  %v1864_v12 = vadd.f32 %v289_v11, %v270_v1  ;;  %v1077_v1 = vmul.f32 %v1483_v40, %v1633_v28 }
  0xf1   :  { %v1862_v7 = vadd.f32 %v1330_v10, %v1304_v6  ;;  %v991_v49 = vsel %vm284_vm2, %v966_v38, 0.0  ;;  %v1104_v6 = vsel %vm284_vm2, %v1079_v2, 0.0  ;;  %v1455_v38 = vld [vmem:[%s2482_s2 + $0xe8] sm:$0xff] }
  0xf2   :  { %650 = vadd.xlane.f32.xlu0 %v649_v8  ;;  %654 = vadd.xlane.f32.xlu1 %v653_v9  ;;  %v862_v8 = vsel %vm284_vm2, %v845_v56, 0.0  ;;  %v1852_v9 = vadd.f32 %v1326_v5, %v1302_v61  ;;  %v1484_v56 = vld [vmem:[%s2482_s2 + $0x1d0] sm:$0xff]  ;;  %v1100_v5 = vsel %vm284_vm2, %v1077_v1, 0.0  ;;  %v1471_v1 = vld [vmem:[%s2482_s2 + $0x168] sm:$0xff] }
  0xf3   :  { %v863_v14 = vadd.f32 %v862_v8, %v844_v51  ;;  %v1071_v51 = vmul.f32 %v1485_v41, %v1658_v43  ;;  %v1070_v61 = vmul.f32 %v1484_v56, %v1666_v46  ;;  %v1078_v10 = vmul.f32 %v1484_v56, %v1643_v36 }
  0xf5   :  { %v1088_v0 = vsel %vm284_vm2, %v1071_v51, 0.0  ;;  %v1105_v11 = vadd.f32 %v1104_v6, %v1078_v10  ;;  %v1470_v6 = vld [vmem:[%s2482_s2 + $0x160] sm:$0xff] }
  0xf6   :  { %747 = vadd.xlane.f32.xlu0 %v746_v13  ;;  %751 = vadd.xlane.f32.xlu1 %v750_v19  ;;  %v859_v13 = vadd.f32 %v858_v55, %v842_v21  ;;  %v956_v19 = vmul.f32 %v1475_v39, %v1631_v27  ;;  %v1474_v21 = vld [vmem:[%s2482_s2 + $0x180] sm:$0xff]  ;;  %v1089_v4 = vadd.f32 %v1088_v0, %v1070_v61 }
  0xf7   :  { %v955_v31 = vmul.f32 %v1474_v21, %v1626_v23  ;;  %v963_v53 = vmul.f32 %v1474_v21, %v1641_v35  ;;  %v1482_v55 = vld [vmem:[%s2482_s2 + $0x1c0] sm:$0xff] }
  0xf8   :  { %v971_v33 = vsel %vm284_vm2, %v956_v19, 0.0  ;;  %v1068_v27 = vmul.f32 %v1482_v55, %v1626_v23  ;;  %v1184_v23 = vmul.f32 %v1784_v18, %v1658_v43  ;;  %v1076_v8 = vmul.f32 %v1482_v55, %v1641_v35 }
  0xf9   :  { %v972_v44 = vadd.f32 %v971_v33, %v955_v31  ;;  %v988_v58 = vadd.f32 %v987_v48, %v963_v53  ;;  %v1463_v53 = vld [vmem:[%s2482_s2 + $0x128] sm:$0xff] }
  0xfa   :  { %763 = vadd.xlane.f32.xlu0 %v762_v20  ;;  %767 = vadd.xlane.f32.xlu1 %v766_v26  ;;  %v958_v20 = vmul.f32 %v1477_v45, %v1658_v43  ;;  %v1476_v26 = vld [vmem:[%s2482_s2 + $0x190] sm:$0xff]  ;;  %v1085_v3 = vadd.f32 %v1084_v62, %v1068_v27  ;;  %v1101_v28 = vadd.f32 %v1100_v5, %v1076_v8  ;;  %v1201_v39 = vsel %vm284_vm2, %v1184_v23, 0.0  ;;  %v136_v45 = vpop.f32.mrf.mxu0 }
  0xfb   :  { %v957_v32 = vmul.f32 %v1476_v26, %v1666_v46  ;;  %v965_v54 = vmul.f32 %v1476_v26, %v1643_v36  ;;  %v265_v36 = vld [vmem:[%s2482_s2 + $0x28] sm:$0xff]  ;;  %v1928_v24 = vmax.f32 %v136_v45, 0.0 }
  0xfc   :  { %v975_v15 = vsel %vm284_vm2, %v958_v20, 0.0  ;;  %v138_v43 = vpop.f32.mrf.mxu0 }
  0xfd   :  { %v976_v47 = vadd.f32 %v975_v15, %v957_v32  ;;  %v992_v60 = vadd.f32 %v991_v49, %v965_v54  ;;  %v1919_v35 = vmax.f32 %v138_v43, 0.0  ;;  %v394_v26 = vmul.f32 %v1438_v22, %v1928_v24 }
  0xfe   :  { %860 = vadd.xlane.f32.xlu0 %v859_v13  ;;  %864 = vadd.xlane.f32.xlu1 %v863_v14  ;;  %v1202_v13 = vadd.f32 %v1201_v39, %v1183_v42  ;;  %v231_v14 = vpop.f32.mrf.mxu1 }
  0xff   :  { %v273_v16 = vmul.f32 %v265_v36, %v1919_v35  ;;  %v621_v56 = vmul.f32 %v1455_v38, %v1919_v35  ;;  %v847_v45 = vmul.f32 %v1471_v1, %v1919_v35 }
 0x100   :  { %v233_v18 = vpop.f32.mrf.mxu1 }
 0x101   :  { %v1926_v46 = vmax.f32 %v233_v18, 0.0  ;;  %v293_v20 = vsel %vm284_vm2, %v273_v16, 0.0  ;;  %v640_v2 = vsel %vm284_vm2, %v621_v56, 0.0  ;;  %v142_v16 = vpop.f32.mrf.mxu0  ;;  %v1502_v56 = vld [vmem:[%s2482_s2 + $0x260] sm:$0xff] }
 0x102   :  { %876 = vadd.xlane.f32.xlu0 %v875_v29  ;;  %880 = vadd.xlane.f32.xlu1 %v879_v30  ;;  %v1447_v29 = vld [vmem:[%s2482_s2 + $0xa8] sm:$0xff] }
 0x103   :  { %v281_v17 = vmul.f32 %v265_v36, %v1926_v46  ;;  %v516_v32 = vmul.f32 %v1447_v29, %v1926_v46  ;;  %v855_v5 = vmul.f32 %v1471_v1, %v1926_v46  ;;  %v846_v36 = vmul.f32 %v1470_v6, %v1928_v24 }
 0x105   :  { %v309_v25 = vsel %vm284_vm2, %v281_v17, 0.0  ;;  %v543_v41 = vsel %vm284_vm2, %v516_v32, 0.0  ;;  %v882_v39 = vsel %vm284_vm2, %v855_v5, 0.0  ;;  %v866_v17 = vsel %vm284_vm2, %v847_v45, 0.0 }
 0x106   :  { %973 = vadd.xlane.f32.xlu0 %v972_v44  ;;  %977 = vadd.xlane.f32.xlu1 %v976_v47  ;;  %v629_v44 = vmul.f32 %v1455_v38, %v1926_v46  ;;  %v1454_v47 = vld [vmem:[%s2482_s2 + $0xe0] sm:$0xff] }
 0x107   :  { %v620_v62 = vmul.f32 %v1454_v47, %v1928_v24 }
 0x108   :  { %v656_v55 = vsel %vm284_vm2, %v629_v44, 0.0  ;;  %v1503_v44 = vld [vmem:[%s2482_s2 + $0x268] sm:$0xff] }
 0x109   :  { %v641_v23 = vadd.f32 %v640_v2, %v620_v62 }
 0x10a   :  { %989 = vadd.xlane.f32.xlu0 %v988_v58  ;;  %993 = vadd.xlane.f32.xlu1 %v992_v60  ;;  %v742_v58 = vmul.f32 %v1463_v53, %v1926_v46  ;;  %v1462_v60 = vld [vmem:[%s2482_s2 + $0x120] sm:$0xff] }
 0x10b   :  { %v733_v10 = vmul.f32 %v1462_v60, %v1928_v24 }
 0x10e   :  { %1086 = vadd.xlane.f32.xlu0 %v1085_v3  ;;  %1090 = vadd.xlane.f32.xlu1 %v1089_v4  ;;  %v769_v3 = vsel %vm284_vm2, %v742_v58, 0.0  ;;  %v734_v4 = vmul.f32 %v1463_v53, %v1919_v35  ;;  %v267_v53 = vld [vmem:[%s2482_s2 + $0x38] sm:$0xff] }
 0x110   :  { %v753_v42 = vsel %vm284_vm2, %v734_v4, 0.0 }
 0x111   :  { %v754_v43 = vadd.f32 %v753_v42, %v733_v10 }
 0x112   :  { %1102 = vadd.xlane.f32.xlu0 %v1101_v28  ;;  %1106 = vadd.xlane.f32.xlu1 %v1105_v11  ;;  %v1479_v11 = vld [vmem:[%s2482_s2 + $0x1a8] sm:$0xff] }
 0x116   :  { %1199 = vadd.xlane.f32.xlu0 %v1809_v37  ;;  %1203 = vadd.xlane.f32.xlu1 %v1202_v13  ;;  %v264_v37 = vld [vmem:[%s2482_s2 + $0x20] sm:$0xff]  ;;  %v968_v13 = vmul.f32 %v1479_v11, %v1926_v46 }
 0x117   :  { %v272_v19 = vmul.f32 %v264_v37, %v1928_v24 }
 0x119   :  { %v294_v21 = vadd.f32 %v293_v20, %v272_v19  ;;  %v995_v19 = vsel %vm284_vm2, %v968_v13, 0.0  ;;  %v960_v20 = vmul.f32 %v1479_v11, %v1919_v35 }
 0x11a   :  { %1215 = vadd.xlane.f32.xlu0 %v1826_v52  ;;  %1219 = vadd.xlane.f32.xlu1 %v1832_v57  ;;  %v1936_v52 = vmax.f32 %v231_v14, 0.0  ;;  %v1439_v57 = vld [vmem:[%s2482_s2 + $0x68] sm:$0xff]  ;;  %v1478_v14 = vld [vmem:[%s2482_s2 + $0x1a0] sm:$0xff] }
 0x11b   :  { %v403_v31 = vmul.f32 %v1439_v57, %v1926_v46 }
 0x11c   :  { %v402_v15 = vmul.f32 %v1438_v22, %v1936_v52  ;;  %v628_v51 = vmul.f32 %v1454_v47, %v1936_v52  ;;  %v741_v0 = vmul.f32 %v1462_v60, %v1936_v52  ;;  %v854_v28 = vmul.f32 %v1470_v6, %v1936_v52 }
 0x11d   :  { %v430_v40 = vsel %vm284_vm2, %v403_v31, 0.0  ;;  %v979_v31 = vsel %vm284_vm2, %v960_v20, 0.0  ;;  %v1456_v20 = vld [vmem:[%s2482_s2 + $0xf0] sm:$0xff] }
 0x11e   :  { %1312 = vadd.xlane.f32.xlu0 %v1835_v59  ;;  %1316 = vadd.xlane.f32.xlu1 %v1840_v63  ;;  %v395_v59 = vmul.f32 %v1439_v57, %v1919_v35  ;;  %v280_v63 = vmul.f32 %v264_v37, %v1936_v52  ;;  %v431_v48 = vadd.f32 %v430_v40, %v402_v15  ;;  %v1487_v57 = vld [vmem:[%s2482_s2 + $0x1e8] sm:$0xff] }
 0x11f   :  { %v657_v61 = vadd.f32 %v656_v55, %v628_v51  ;;  %v770_v8 = vadd.f32 %v769_v3, %v741_v0  ;;  %v883_v18 = vadd.f32 %v882_v39, %v854_v28  ;;  %v967_v37 = vmul.f32 %v1478_v14, %v1936_v52  ;;  %v1441_v3 = vld [vmem:[%s2482_s2 + $0x78] sm:$0xff] }
 0x120   :  { %v414_v30 = vsel %vm284_vm2, %v395_v59, 0.0  ;;  %v1081_v22 = vmul.f32 %v1487_v57, %v1926_v46  ;;  %v1486_v59 = vld [vmem:[%s2482_s2 + $0x1e0] sm:$0xff] }
 0x121   :  { %v415_v33 = vadd.f32 %v414_v30, %v394_v26  ;;  %v1080_v26 = vmul.f32 %v1486_v59, %v1936_v52  ;;  %v1495_v30 = vld [vmem:[%s2482_s2 + $0x228] sm:$0xff] }
 0x122   :  { %1328 = vadd.xlane.f32.xlu0 %v1852_v9  ;;  %1332 = vadd.xlane.f32.xlu1 %v1862_v7  ;;  %v310_v9 = vadd.f32 %v309_v25, %v280_v63  ;;  %v1446_v7 = vld [vmem:[%s2482_s2 + $0xa0] sm:$0xff]  ;;  %v867_v63 = vadd.f32 %v866_v17, %v846_v36  ;;  %v996_v25 = vadd.f32 %v995_v19, %v967_v37  ;;  %v1108_v32 = vsel %vm284_vm2, %v1081_v22, 0.0  ;;  %v1457_v37 = vld [vmem:[%s2482_s2 + $0xf8] sm:$0xff] }
 0x123   :  { %v515_v34 = vmul.f32 %v1446_v7, %v1936_v52  ;;  %v507_v50 = vmul.f32 %v1446_v7, %v1928_v24  ;;  %v1194_v7 = vmul.f32 %v1495_v30, %v1926_v46  ;;  %v1109_v40 = vadd.f32 %v1108_v32, %v1080_v26  ;;  %v1465_v26 = vld [vmem:[%s2482_s2 + $0x138] sm:$0xff] }
 0x125   :  { %v544_v49 = vadd.f32 %v543_v41, %v515_v34  ;;  %v1494_v34 = vld [vmem:[%s2482_s2 + $0x220] sm:$0xff]  ;;  %v1072_v41 = vmul.f32 %v1486_v59, %v1928_v24 }
 0x126   :  { %291 = vadd.xlane.f32.xlu0 %v1864_v12  ;;  %295 = vadd.xlane.f32.xlu1 %v294_v21  ;;  %v508_v12 = vmul.f32 %v1447_v29, %v1919_v35  ;;  %v959_v21 = vmul.f32 %v1478_v14, %v1928_v24  ;;  %v144_v29 = vpop.f32.mrf.mxu0  ;;  %v1185_v55 = vmul.f32 %v1494_v34, %v1928_v24 }
 0x127   :  { %v2032_v15 = vmax.f32 %v144_v29, 0.0 }
 0x128   :  { %v527_v54 = vsel %vm284_vm2, %v508_v12, 0.0  ;;  %v980_v38 = vadd.f32 %v979_v31, %v959_v21  ;;  %v1193_v12 = vmul.f32 %v1494_v34, %v1936_v52 }
 0x129   :  { %v528_v27 = vadd.f32 %v527_v54, %v507_v50  ;;  %v1307_v50 = vmul.f32 %v1503_v44, %v1926_v46  ;;  %v2049_v54 = vmax.f32 %v142_v16, 0.0  ;;  %v1299_v46 = vmul.f32 %v1503_v44, %v1919_v35 }
 0x12a   :  { %311 = vadd.xlane.f32.xlu0 %v310_v9  ;;  %416 = vadd.xlane.f32.xlu1 %v415_v33  ;;  %v1073_v9 = vmul.f32 %v1487_v57, %v1919_v35  ;;  %v237_v33 = vpop.f32.mrf.mxu1  ;;  %v275_v2 = vmul.f32 %v267_v53, %v2032_v15  ;;  %v397_v10 = vmul.f32 %v1441_v3, %v2032_v15 }
 0x12b   :  { %v1334_v1 = vsel %vm284_vm2, %v1307_v50, 0.0  ;;  %v623_v22 = vmul.f32 %v1457_v37, %v2032_v15  ;;  %v622_v29 = vmul.f32 %v1456_v20, %v2049_v54  ;;  %v736_v34 = vmul.f32 %v1465_v26, %v2032_v15 }
 0x12c   :  { %v1092_v47 = vsel %vm284_vm2, %v1073_v9, 0.0  ;;  %v239_v51 = vpop.f32.mrf.mxu1  ;;  %v297_v28 = vsel %vm284_vm2, %v275_v2, 0.0  ;;  %v418_v14 = vsel %vm284_vm2, %v397_v10, 0.0 }
 0x12d   :  { %v1093_v58 = vadd.f32 %v1092_v47, %v1072_v41  ;;  %v2060_v62 = vmax.f32 %v239_v51, 0.0  ;;  %v644_v32 = vsel %vm284_vm2, %v623_v22, 0.0  ;;  %v1473_v41 = vld [vmem:[%s2482_s2 + $0x178] sm:$0xff]  ;;  %v757_v51 = vsel %vm284_vm2, %v736_v34, 0.0 }
 0x12e   :  { %432 = vadd.xlane.f32.xlu0 %v431_v48  ;;  %545 = vadd.xlane.f32.xlu1 %v544_v49  ;;  %v1221_v48 = vsel %vm284_vm2, %v1194_v7, 0.0  ;;  %v1186_v49 = vmul.f32 %v1495_v30, %v1919_v35  ;;  %v1298_v35 = vmul.f32 %v1502_v56, %v1928_v24  ;;  %v1449_v24 = vld [vmem:[%s2482_s2 + $0xb8] sm:$0xff]  ;;  %v1464_v7 = vld [vmem:[%s2482_s2 + $0x130] sm:$0xff]  ;;  %v645_v44 = vadd.f32 %v644_v32, %v622_v29 }
 0x12f   :  { %v1222_v60 = vadd.f32 %v1221_v48, %v1193_v12  ;;  %v283_v11 = vmul.f32 %v267_v53, %v2060_v62  ;;  %v405_v36 = vmul.f32 %v1441_v3, %v2060_v62  ;;  %v518_v21 = vmul.f32 %v1449_v24, %v2060_v62  ;;  %v1480_v3 = vld [vmem:[%s2482_s2 + $0x1b0] sm:$0xff] }
 0x130   :  { %v1205_v0 = vsel %vm284_vm2, %v1186_v49, 0.0  ;;  %v735_v12 = vmul.f32 %v1464_v7, %v2049_v54  ;;  %v1472_v49 = vld [vmem:[%s2482_s2 + $0x170] sm:$0xff]  ;;  %v849_v50 = vmul.f32 %v1473_v41, %v2032_v15 }
 0x131   :  { %v1206_v5 = vadd.f32 %v1205_v0, %v1185_v55  ;;  %v313_v16 = vsel %vm284_vm2, %v283_v11, 0.0 }
 0x132   :  { %529 = vadd.xlane.f32.xlu0 %v528_v27  ;;  %658 = vadd.xlane.f32.xlu1 %v657_v61  ;;  %v1306_v27 = vmul.f32 %v1502_v56, %v1936_v52  ;;  %v266_v61 = vld [vmem:[%s2482_s2 + $0x30] sm:$0xff]  ;;  %v2068_v52 = vmax.f32 %v237_v33, 0.0  ;;  %v547_v33 = vsel %vm284_vm2, %v518_v21, 0.0  ;;  %v744_v56 = vmul.f32 %v1465_v26, %v2060_v62 }
 0x133   :  { %v274_v4 = vmul.f32 %v266_v61, %v2049_v54 }
 0x134   :  { %v1335_v6 = vadd.f32 %v1334_v1, %v1306_v27  ;;  %v282_v45 = vmul.f32 %v266_v61, %v2068_v52  ;;  %v630_v48 = vmul.f32 %v1456_v20, %v2068_v52  ;;  %v758_v27 = vadd.f32 %v757_v51, %v735_v12  ;;  %v1504_v12 = vld [vmem:[%s2482_s2 + $0x270] sm:$0xff] }
 0x135   :  { %v298_v13 = vadd.f32 %v297_v28, %v274_v4  ;;  %v870_v61 = vsel %vm284_vm2, %v849_v50, 0.0  ;;  %v743_v0 = vmul.f32 %v1464_v7, %v2068_v52  ;;  %v773_v1 = vsel %vm284_vm2, %v744_v56, 0.0 }
 0x136   :  { %642 = vadd.xlane.f32.xlu0 %v641_v23  ;;  %771 = vadd.xlane.f32.xlu1 %v770_v8  ;;  %v1318_v23 = vsel %vm284_vm2, %v1299_v46, 0.0  ;;  %v1440_v8 = vld [vmem:[%s2482_s2 + $0x70] sm:$0xff]  ;;  %v314_v59 = vadd.f32 %v313_v16, %v282_v45  ;;  %v857_v4 = vmul.f32 %v1473_v41, %v2060_v62  ;;  %v961_v28 = vmul.f32 %v1480_v3, %v2049_v54 }
 0x137   :  { %v1319_v42 = vadd.f32 %v1318_v23, %v1298_v35  ;;  %v396_v39 = vmul.f32 %v1440_v8, %v2049_v54  ;;  %v404_v19 = vmul.f32 %v1440_v8, %v2068_v52  ;;  %v774_v10 = vadd.f32 %v773_v1, %v743_v0  ;;  %v1488_v45 = vld [vmem:[%s2482_s2 + $0x1f0] sm:$0xff] }
 0x138   :  { %v856_v11 = vmul.f32 %v1472_v49, %v2068_v52  ;;  %v1300_v56 = vmul.f32 %v1504_v12, %v2049_v54 }
 0x139   :  { %v419_v57 = vadd.f32 %v418_v14, %v396_v39  ;;  %v886_v39 = vsel %vm284_vm2, %v857_v4, 0.0 }
 0x13a   :  { %755 = vadd.xlane.f32.xlu0 %v754_v43  ;;  %884 = vadd.xlane.f32.xlu1 %v883_v18  ;;  %v1448_v43 = vld [vmem:[%s2482_s2 + $0xb0] sm:$0xff]  ;;  %v510_v18 = vmul.f32 %v1449_v24, %v2032_v15 }
 0x13b   :  { %v509_v17 = vmul.f32 %v1448_v43, %v2049_v54  ;;  %v517_v9 = vmul.f32 %v1448_v43, %v2068_v52  ;;  %v1497_v43 = vld [vmem:[%s2482_s2 + $0x238] sm:$0xff] }
 0x13d   :  { %v548_v47 = vadd.f32 %v547_v33, %v517_v9  ;;  %v1082_v33 = vmul.f32 %v1488_v45, %v2068_v52 }
 0x13e   :  { %868 = vadd.xlane.f32.xlu0 %v867_v63  ;;  %997 = vadd.xlane.f32.xlu1 %v996_v25  ;;  %v531_v63 = vsel %vm284_vm2, %v510_v18, 0.0  ;;  %v434_v25 = vsel %vm284_vm2, %v405_v36, 0.0 }
 0x13f   :  { %v532_v30 = vadd.f32 %v531_v63, %v509_v17  ;;  %v435_v31 = vadd.f32 %v434_v25, %v404_v19  ;;  %v1074_v17 = vmul.f32 %v1488_v45, %v2049_v54  ;;  %v969_v19 = vmul.f32 %v1480_v3, %v2068_v52  ;;  %v1496_v63 = vld [vmem:[%s2482_s2 + $0x230] sm:$0xff] }
 0x140   :  { %v1188_v25 = vmul.f32 %v1497_v43, %v2032_v15  ;;  %v1187_v7 = vmul.f32 %v1496_v63, %v2049_v54  ;;  %v1308_v3 = vmul.f32 %v1504_v12, %v2068_v52 }
 0x142   :  { %981 = vadd.xlane.f32.xlu0 %v980_v38  ;;  %1110 = vadd.xlane.f32.xlu1 %v1109_v40  ;;  %v631_v38 = vmul.f32 %v1457_v37, %v2060_v62  ;;  %v258_v40 = vlaneseq  ;;  %v1209_v41 = vsel %vm284_vm2, %v1188_v25, 0.0 }
 0x144   :  { %v660_v53 = vsel %vm284_vm2, %v631_v38, 0.0  ;;  %v2126_v55 = vand.u32 127, %v258_v40 }
 0x145   :  { %v661_v46 = vadd.f32 %v660_v53, %v630_v48  ;;  %v1196_v48 = vmul.f32 %v1497_v43, %v2060_v62  ;;  %v1210_v53 = vadd.f32 %v1209_v41, %v1187_v7 }
 0x146   :  { %1094 = vadd.xlane.f32.xlu0 %v1093_v58  ;;  %1223 = vadd.xlane.f32.xlu1 %v1222_v60  ;;  %v1481_v58 = vld [vmem:[%s2482_s2 + $0x1b8] sm:$0xff]  ;;  %v848_v60 = vmul.f32 %v1472_v49, %v2049_v54  ;;  %v329_v2 = vadd.s32 4294967288, %v2126_v55  ;;  %vm489_vm8 = vcmp.eq.s32.totalorder %v2126_v55, 1  ;;  %vm376_vm9 = vcmp.eq.s32.totalorder %v2126_v55, 0 }
 0x147   :  { %v962_v35 = vmul.f32 %v1481_v58, %v2032_v15  ;;  %v970_v14 = vmul.f32 %v1481_v58, %v2060_v62  ;;  %vm602_vm10 = vcmp.eq.s32.totalorder %v2126_v55, 2  ;;  %vm715_vm11 = vcmp.eq.s32.totalorder %v2126_v55, 3 }
 0x148   :  { %v871_v8 = vadd.f32 %v870_v61, %v848_v60  ;;  %v1225_v61 = vsel %vm284_vm2, %v1196_v48, 0.0  ;;  %vm828_vm12 = vcmp.eq.s32.totalorder %v2126_v55, 4  ;;  %vm941_vm13 = vcmp.eq.s32.totalorder %v2126_v55, 5 }
 0x149   :  { %v999_v21 = vsel %vm284_vm2, %v970_v14, 0.0  ;;  %vm1054_vm14 = vcmp.eq.s32.totalorder %v2126_v55, 6  ;;  %vm1167_vm15 = vcmp.eq.s32.totalorder %v2126_v55, 7  ;;  %vm1280_vm0 = vcmp.eq.s32.totalorder %v2126_v55, 8 }
 0x14a   :  { %1207 = vadd.xlane.f32.xlu0 %v1206_v5  ;;  %1336 = vadd.xlane.f32.xlu1 %v1335_v6  ;;  %v1489_v5 = vld [vmem:[%s2482_s2 + $0x1f8] sm:$0xff]  ;;  %v2145_v6 = vshrl.u32 %v258_v40, 7  ;;  %v1000_v40 = vadd.f32 %v999_v21, %v969_v19  ;;  %vm1393_vm1 = vcmp.eq.s32.totalorder %v2126_v55, 9 }
 0x14b   :  { %v1083_v26 = vmul.f32 %v1489_v5, %v2060_v62 }
 0x14c   :  { %v2152_v24 = vsub.s32 %v329_v2, %v2145_v6  ;;  %v2166_v18 = vsub.s32 %v2126_v55, %v2145_v6 }
 0x14e   :  { %1320 = vadd.xlane.f32.xlu0 %v1319_v42  ;;  %299 = vadd.xlane.f32.xlu1 %v298_v13  ;;  %v983_v42 = vsel %vm284_vm2, %v962_v35, 0.0  ;;  %v1075_v13 = vmul.f32 %v1489_v5, %v2032_v15 }
 0x14f   :  { %v984_v16 = vadd.f32 %v983_v42, %v961_v28 }
 0x152   :  { %420 = vadd.xlane.f32.xlu0 %v419_v57  ;;  %315 = vadd.xlane.f32.xlu1 %v314_v59  ;;  %v887_v57 = vadd.f32 %v886_v39, %v856_v11  ;;  %v1096_v59 = vsel %vm284_vm2, %v1075_v13, 0.0 }
 0x153   :  { %v1097_v9 = vadd.f32 %v1096_v59, %v1074_v17 }
 0x156   :  { %533 = vadd.xlane.f32.xlu0 %v532_v30  ;;  %436 = vadd.xlane.f32.xlu1 %v435_v31  ;;  %v1505_v30 = vld [vmem:[%s2482_s2 + $0x278] sm:$0xff] }
 0x157   :  { %v1309_v0 = vmul.f32 %v1505_v30, %v2060_v62 }
 0x15a   :  { %646 = vadd.xlane.f32.xlu0 %v645_v44  ;;  %549 = vadd.xlane.f32.xlu1 %v548_v47  ;;  %v1112_v44 = vsel %vm284_vm2, %v1083_v26, 0.0  ;;  %v1301_v47 = vmul.f32 %v1505_v30, %v2032_v15 }
 0x15c   :  { %v1322_v15 = vsel %vm284_vm2, %v1301_v47, 0.0 }
 0x15d   :  { %v1323_v5 = vadd.f32 %v1322_v15, %v1300_v56 }
 0x15e   :  { %759 = vadd.xlane.f32.xlu0 %v758_v27  ;;  %662 = vadd.xlane.f32.xlu1 %v661_v46  ;;  %v1113_v27 = vadd.f32 %v1112_v44, %v1082_v33  ;;  %v1195_v46 = vmul.f32 %v1496_v63, %v2068_v52 }
 0x15f   :  { %v2147_v23 = vpop.xlane.xlu0 %287 }
 0x162   :  { %872 = vadd.xlane.f32.xlu0 %v871_v8  ;;  %775 = vadd.xlane.f32.xlu1 %v774_v10  ;;  %v1226_v8 = vadd.f32 %v1225_v61, %v1195_v46  ;;  %v1338_v10 = vsel %vm284_vm2, %v1309_v0, 0.0  ;;  %vm1406_vm2 = vcmask 74752  }
 0x163   :  { %v308_v36 = vpop.xlane.xlu1 %307  ;;  %v304_v37 = vpop.xlane.xlu0 %303  ;;  %v1339_v52 = vadd.f32 %v1338_v10, %v1308_v3 }
 0x164   :  { %v357_v20 = vrot.slane %v308_v36, %v2152_v24  ;;  %v353_v22 = vrot.slane %v304_v37, %v2166_v18 }
 0x166   :  { %v2180_v29 = vsel %vm334_vm3, %v357_v20, %v353_v22  ;;  %985 = vadd.xlane.f32.xlu0 %v984_v16  ;;  %888 = vadd.xlane.f32.xlu1 %v887_v57 }
 0x167   :  { %v409_v31 = vpop.xlane.xlu0 %408  ;;  %v413_v32 = vpop.xlane.xlu1 %412 }
 0x168   :  { %v449_v34 = vrot.slane %v409_v31, %v2166_v18  ;;  %v453_v38 = vrot.slane %v413_v32, %v2152_v24 }
 0x16a   :  { %v2197_v49 = vsel %vm334_vm3, %v453_v38, %v449_v34  ;;  %1098 = vadd.xlane.f32.xlu0 %v1097_v9  ;;  %1001 = vadd.xlane.f32.xlu1 %v1000_v40 }
 0x16b   :  { %v425_v50 = vpop.xlane.xlu0 %424  ;;  %v429_v51 = vpop.xlane.xlu1 %428 }
 0x16c   :  { %v468_v58 = vrot.slane %v425_v50, %v2166_v18  ;;  %v472_v60 = vrot.slane %v429_v51, %v2152_v24 }
 0x16e   :  { %v2207_v1 = vsel %vm334_vm3, %v472_v60, %v468_v58  ;;  %1211 = vadd.xlane.f32.xlu0 %v1210_v53  ;;  %1114 = vadd.xlane.f32.xlu1 %v1113_v27 }
 0x16f   :  { %v522_v2 = vpop.xlane.xlu0 %521  ;;  %v526_v54 = vpop.xlane.xlu1 %525 }
 0x170   :  { %v562_v35 = vrot.slane %v522_v2, %v2166_v18  ;;  %v566_v4 = vrot.slane %v526_v54, %v2152_v24 }
 0x172   :  { %v2214_v28 = vsel %vm334_vm3, %v566_v4, %v562_v35  ;;  %1324 = vadd.xlane.f32.xlu0 %v1323_v5  ;;  %1227 = vadd.xlane.f32.xlu1 %v1226_v8 }
 0x173   :  { %v538_v62 = vpop.xlane.xlu0 %537  ;;  %v542_v11 = vpop.xlane.xlu1 %541 }
 0x174   :  { %v581_v42 = vrot.slane %v538_v62, %v2166_v18  ;;  %v585_v39 = vrot.slane %v542_v11, %v2152_v24 }
 0x176   :  { %v2219_v45 = vsel %vm334_vm3, %v585_v39, %v581_v42  ;;  %1340 = vadd.xlane.f32.xlu1 %v1339_v52 }
 0x177   :  { %v635_v13 = vpop.xlane.xlu0 %634  ;;  %v639_v14 = vpop.xlane.xlu1 %638 }
 0x178   :  { %v675_v43 = vrot.slane %v635_v13, %v2166_v18  ;;  %v679_v36 = vrot.slane %v639_v14, %v2152_v24 }
 0x17a   :  { %v2224_v37 = vsel %vm334_vm3, %v679_v36, %v675_v43 }
 0x17b   :  { %v651_v16 = vpop.xlane.xlu0 %650  ;;  %v655_v57 = vpop.xlane.xlu1 %654 }
 0x17c   :  { %v694_v17 = vrot.slane %v651_v16, %v2166_v18  ;;  %v698_v19 = vrot.slane %v655_v57, %v2152_v24 }
 0x17e   :  { %v2229_v20 = vsel %vm334_vm3, %v698_v19, %v694_v17 }
 0x17f   :  { %v748_v22 = vpop.xlane.xlu0 %747  ;;  %v752_v59 = vpop.xlane.xlu1 %751 }
 0x180   :  { %v788_v63 = vrot.slane %v748_v22, %v2166_v18  ;;  %v792_v25 = vrot.slane %v752_v59, %v2152_v24 }
 0x182   :  { %v2234_v21 = vsel %vm334_vm3, %v792_v25, %v788_v63 }
 0x183   :  { %v764_v26 = vpop.xlane.xlu0 %763  ;;  %v768_v30 = vpop.xlane.xlu1 %767 }
 0x184   :  { %v807_v31 = vrot.slane %v764_v26, %v2166_v18  ;;  %v811_v32 = vrot.slane %v768_v30, %v2152_v24 }
 0x186   :  { %v2239_v9 = vsel %vm334_vm3, %v811_v32, %v807_v31 }
 0x187   :  { %v861_v7 = vpop.xlane.xlu0 %860  ;;  %v865_v33 = vpop.xlane.xlu1 %864 }
 0x188   :  { %v901_v34 = vrot.slane %v861_v7, %v2166_v18  ;;  %v905_v38 = vrot.slane %v865_v33, %v2152_v24 }
 0x18a   :  { %v2244_v40 = vsel %vm334_vm3, %v905_v38, %v901_v34 }
 0x18b   :  { %v877_v41 = vpop.xlane.xlu0 %876  ;;  %v881_v12 = vpop.xlane.xlu1 %880 }
 0x18c   :  { %v920_v44 = vrot.slane %v877_v41, %v2166_v18  ;;  %v924_v47 = vrot.slane %v881_v12, %v2152_v24 }
 0x18e   :  { %v2249_v48 = vsel %vm334_vm3, %v924_v47, %v920_v44 }
 0x18f   :  { %v974_v50 = vpop.xlane.xlu0 %973  ;;  %v978_v51 = vpop.xlane.xlu1 %977 }
 0x190   :  { %v1014_v53 = vrot.slane %v974_v50, %v2166_v18  ;;  %v1018_v56 = vrot.slane %v978_v51, %v2152_v24 }
 0x192   :  { %v2254_v58 = vsel %vm334_vm3, %v1018_v56, %v1014_v53 }
 0x193   :  { %v990_v60 = vpop.xlane.xlu0 %989  ;;  %v994_v27 = vpop.xlane.xlu1 %993 }
 0x194   :  { %v1033_v46 = vrot.slane %v990_v60, %v2166_v18  ;;  %v1037_v15 = vrot.slane %v994_v27, %v2152_v24 }
 0x196   :  { %v2259_v61 = vsel %vm334_vm3, %v1037_v15, %v1033_v46 }
 0x197   :  { %v1087_v0 = vpop.xlane.xlu0 %1086  ;;  %v1091_v2 = vpop.xlane.xlu1 %1090 }
 0x198   :  { %v1127_v54 = vrot.slane %v1087_v0, %v2166_v18  ;;  %v1131_v3 = vrot.slane %v1091_v2, %v2152_v24 }
 0x19a   :  { %v2264_v35 = vsel %vm334_vm3, %v1131_v3, %v1127_v54  ;;  %v336_v54 = vadd.s32 4294967280, %v2126_v55  ;;  %v343_v3 = vadd.s32 4294967272, %v2126_v55 }
 0x19b   :  { %v1103_v4 = vpop.xlane.xlu0 %1102  ;;  %v1107_v5 = vpop.xlane.xlu1 %1106 }
 0x19c   :  { %v1146_v8 = vrot.slane %v1103_v4, %v2166_v18  ;;  %v1150_v10 = vrot.slane %v1107_v5, %v2152_v24 }
 0x19e   :  { %v2269_v62 = vsel %vm334_vm3, %v1150_v10, %v1146_v8  ;;  %v2320_v8 = vsub.s32 %v336_v54, %v2145_v6 }
 0x19f   :  { %v1200_v11 = vpop.xlane.xlu0 %1199  ;;  %v1204_v42 = vpop.xlane.xlu1 %1203 }
 0x1a0   :  { %v1240_v39 = vrot.slane %v1200_v11, %v2166_v18  ;;  %v1244_v52 = vrot.slane %v1204_v42, %v2152_v24  ;;  %v2324_v11 = vsub.s32 %v343_v3, %v2145_v6 }
 0x1a2   :  { %v2274_v13 = vsel %vm334_vm3, %v1244_v52, %v1240_v39  ;;  %v328_v52 = vrot.slane %v2147_v23, %v2166_v18 }
 0x1a3   :  { %v1216_v14 = vpop.xlane.xlu0 %1215  ;;  %v1220_v43 = vpop.xlane.xlu1 %1219 }
 0x1a4   :  { %v1259_v36 = vrot.slane %v1216_v14, %v2166_v18  ;;  %v1263_v16 = vrot.slane %v1220_v43, %v2152_v24 }
 0x1a6   :  { %v2279_v57 = vsel %vm334_vm3, %v1263_v16, %v1259_v36 }
 0x1a7   :  { %v1313_v17 = vpop.xlane.xlu0 %1312  ;;  %v1317_v19 = vpop.xlane.xlu1 %1316 }
 0x1a8   :  { %v1353_v22 = vrot.slane %v1313_v17, %v2166_v18  ;;  %v1357_v59 = vrot.slane %v1317_v19, %v2152_v24 }
 0x1aa   :  { %v2284_v63 = vsel %vm334_vm3, %v1357_v59, %v1353_v22 }
 0x1ab   :  { %v1329_v25 = vpop.xlane.xlu0 %1328  ;;  %v1333_v26 = vpop.xlane.xlu1 %1332 }
 0x1ac   :  { %v1372_v30 = vrot.slane %v1329_v25, %v2166_v18  ;;  %v1376_v31 = vrot.slane %v1333_v26, %v2152_v24 }
 0x1ae   :  { %v2289_v32 = vsel %vm334_vm3, %v1376_v31, %v1372_v30 }
 0x1af   :  { %v292_v7 = vpop.xlane.xlu0 %291  ;;  %v296_v33 = vpop.xlane.xlu1 %295 }
 0x1b0   :  { %v333_v10 = vrot.slane %v292_v7, %v2152_v24  ;;  %v340_v14 = vrot.slane %v296_v33, %v2320_v8 }
 0x1b2   :  { %v335_v36 = vsel %vm334_vm3, %v333_v10, %v328_v52 }
 0x1b3   :  { %v312_v34 = vpop.xlane.xlu0 %311  ;;  %v417_v38 = vpop.xlane.xlu1 %416  ;;  %v342_v19 = vsel %vm341_vm4, %v340_v14, %v335_v36 }
 0x1b4   :  { %v362_v43 = vrot.slane %v312_v34, %v2320_v8  ;;  %v458_v18 = vrot.slane %v417_v38, %v2320_v8 }
 0x1b6   :  { %v363_v23 = vsel %vm341_vm4, %v362_v43, %v2180_v29  ;;  %v459_v29 = vsel %vm341_vm4, %v458_v18, %v2197_v49 }
 0x1b7   :  { %v433_v41 = vpop.xlane.xlu0 %432  ;;  %v546_v12 = vpop.xlane.xlu1 %545 }
 0x1b8   :  { %v477_v22 = vrot.slane %v433_v41, %v2320_v8  ;;  %v590_v41 = vrot.slane %v546_v12, %v2320_v8 }
 0x1ba   :  { %v478_v38 = vsel %vm341_vm4, %v477_v22, %v2207_v1  ;;  %v591_v1 = vsel %vm341_vm4, %v590_v41, %v2219_v45 }
 0x1bb   :  { %v530_v44 = vpop.xlane.xlu0 %529  ;;  %v2291_v47 = vpop.xlane.xlu1 %658 }
 0x1bc   :  { %v571_v54 = vrot.slane %v530_v44, %v2320_v8  ;;  %v703_v44 = vrot.slane %v2291_v47, %v2320_v8 }
 0x1be   :  { %v572_v12 = vsel %vm341_vm4, %v571_v54, %v2214_v28  ;;  %v704_v47 = vsel %vm341_vm4, %v703_v44, %v2229_v20 }
 0x1bf   :  { %v2293_v50 = vpop.xlane.xlu0 %642  ;;  %v2295_v51 = vpop.xlane.xlu1 %771 }
 0x1c0   :  { %v816_v22 = vrot.slane %v2295_v51, %v2320_v8 }
 0x1c2   :  { %v817_v51 = vsel %vm341_vm4, %v816_v22, %v2239_v9 }
 0x1c3   :  { %v2297_v53 = vpop.xlane.xlu0 %755  ;;  %v2299_v56 = vpop.xlane.xlu1 %884 }
 0x1c7   :  { %v2301_v60 = vpop.xlane.xlu0 %868  ;;  %v2303_v27 = vpop.xlane.xlu1 %997 }
 0x1cb   :  { %v2305_v46 = vpop.xlane.xlu0 %981  ;;  %v2307_v15 = vpop.xlane.xlu1 %1110 }
 0x1cf   :  { %v2309_v0 = vpop.xlane.xlu0 %1094  ;;  %v2311_v2 = vpop.xlane.xlu1 %1223 }
 0x1d3   :  { %v2315_v4 = vpop.xlane.xlu0 %1207  ;;  %v2317_v5 = vpop.xlane.xlu1 %1336 }
 0x1d7   :  { %v2326_v42 = vpop.xlane.xlu0 %1320  ;;  %v300_v39 = vpop.xlane.xlu1 %299 }
 0x1d8   :  { %v347_v16 = vrot.slane %v300_v39, %v2324_v11 }
 0x1da   :  { %v349_v25 = vsel %vm348_vm5, %v347_v16, %v342_v19  ;;  %v684_v16 = vrot.slane %v2293_v50, %v2320_v8 }
 0x1db   :  { %v421_v17 = vpop.xlane.xlu0 %420  ;;  %v316_v24 = vpop.xlane.xlu1 %315 }
 0x1dc   :  { %v367_v6 = vrot.slane %v316_v24, %v2324_v11  ;;  %v463_v59 = vrot.slane %v421_v17, %v2324_v11  ;;  %v685_v50 = vsel %vm341_vm4, %v684_v16, %v2224_v37  ;;  %v1155_v16 = vrot.slane %v2307_v15, %v2320_v8 }
 0x1de   :  { %v368_v26 = vsel %vm348_vm5, %v367_v6, %v363_v23  ;;  %v464_v10 = vsel %vm348_vm5, %v463_v59, %v459_v29  ;;  %v797_v59 = vrot.slane %v2297_v53, %v2320_v8  ;;  %v910_v29 = vrot.slane %v2301_v60, %v2320_v8 }
 0x1df   :  { %v534_v30 = vpop.xlane.xlu0 %533  ;;  %v437_v31 = vpop.xlane.xlu1 %436  ;;  %v370_v7 = vsel %vm369_vm6, %v368_v26, %v349_v25  ;;  %v1156_v15 = vsel %vm341_vm4, %v1155_v16, %v2269_v62 }
 0x1e0   :  { %v482_v33 = vrot.slane %v437_v31, %v2324_v11  ;;  %v373_v34 = vsel %vm372_vm7, %v370_v7, 0.0  ;;  %v576_v3 = vrot.slane %v534_v30, %v2324_v11  ;;  %v798_v53 = vsel %vm341_vm4, %v797_v59, %v2234_v21 }
 0x1e1   :  { %374 = vadd.xlane.f32.xlu0 %v373_v34  ;;  %v929_v34 = vrot.slane %v2299_v56, %v2320_v8  ;;  %v911_v60 = vsel %vm341_vm4, %v910_v29, %v2244_v40 }
 0x1e2   :  { %v483_v39 = vsel %vm348_vm5, %v482_v33, %v478_v38  ;;  %v577_v24 = vsel %vm348_vm5, %v576_v3, %v572_v12 }
 0x1e3   :  { %v647_v52 = vpop.xlane.xlu0 %646  ;;  %v550_v14 = vpop.xlane.xlu1 %549  ;;  %v484_v43 = vsel %vm369_vm6, %v483_v39, %v464_v10  ;;  %v930_v56 = vsel %vm341_vm4, %v929_v34, %v2249_v48 }
 0x1e4   :  { %v595_v49 = vrot.slane %v550_v14, %v2324_v11  ;;  %v486_v36 = vsel %vm372_vm7, %v484_v43, 0.0  ;;  %v689_v17 = vrot.slane %v647_v52, %v2324_v11  ;;  %v1042_v52 = vrot.slane %v2303_v27, %v2320_v8 }
 0x1e5   :  { %487 = vadd.xlane.f32.xlu1 %v486_v36  ;;  %v1023_v14 = vrot.slane %v2305_v46, %v2320_v8 }
 0x1e6   :  { %v596_v6 = vsel %vm348_vm5, %v595_v49, %v591_v1  ;;  %v690_v26 = vsel %vm348_vm5, %v689_v17, %v685_v50  ;;  %v1043_v27 = vsel %vm341_vm4, %v1042_v52, %v2259_v61  ;;  %v1136_v17 = vrot.slane %v2309_v0, %v2320_v8 }
 0x1e7   :  { %v760_v19 = vpop.xlane.xlu0 %759  ;;  %v663_v23 = vpop.xlane.xlu1 %662  ;;  %v597_v45 = vsel %vm369_vm6, %v596_v6, %v577_v24  ;;  %v1024_v46 = vsel %vm341_vm4, %v1023_v14, %v2254_v58 }
 0x1e8   :  { %v708_v18 = vrot.slane %v663_v23, %v2324_v11  ;;  %v599_v28 = vsel %vm372_vm7, %v597_v45, 0.0  ;;  %v802_v25 = vrot.slane %v760_v19, %v2324_v11  ;;  %v1137_v0 = vsel %vm341_vm4, %v1136_v17, %v2264_v35 }
 0x1e9   :  { %600 = vadd.xlane.f32.xlu0 %v599_v28  ;;  %v1268_v28 = vrot.slane %v2311_v2, %v2320_v8 }
 0x1ea   :  { %v709_v30 = vsel %vm348_vm5, %v708_v18, %v704_v47  ;;  %v803_v41 = vsel %vm348_vm5, %v802_v25, %v798_v53  ;;  %v1249_v47 = vrot.slane %v2315_v4, %v2320_v8 }
 0x1eb   :  { %v873_v31 = vpop.xlane.xlu0 %872  ;;  %v776_v7 = vpop.xlane.xlu1 %775  ;;  %v710_v20 = vsel %vm369_vm6, %v709_v30, %v690_v26  ;;  %v1269_v2 = vsel %vm341_vm4, %v1268_v28, %v2279_v57 }
 0x1ec   :  { %v821_v33 = vrot.slane %v776_v7, %v2324_v11  ;;  %v712_v37 = vsel %vm372_vm7, %v710_v20, 0.0  ;;  %v915_v38 = vrot.slane %v873_v31, %v2324_v11  ;;  %v1250_v4 = vsel %vm341_vm4, %v1249_v47, %v2274_v13 }
 0x1ed   :  { %713 = vadd.xlane.f32.xlu1 %v712_v37  ;;  %v1381_v31 = vrot.slane %v2317_v5, %v2320_v8  ;;  %v1362_v7 = vrot.slane %v2326_v42, %v2320_v8 }
 0x1ee   :  { %v822_v54 = vsel %vm348_vm5, %v821_v33, %v817_v51  ;;  %v916_v49 = vsel %vm348_vm5, %v915_v38, %v911_v60 }
 0x1ef   :  { %v986_v3 = vpop.xlane.xlu0 %985  ;;  %v889_v10 = vpop.xlane.xlu1 %888  ;;  %v823_v9 = vsel %vm369_vm6, %v822_v54, %v803_v41  ;;  %v1382_v5 = vsel %vm341_vm4, %v1381_v31, %v2289_v32  ;;  %v1363_v8 = vsel %vm341_vm4, %v1362_v7, %v2284_v63 }
 0x1f0   :  { %v934_v39 = vrot.slane %v889_v10, %v2324_v11  ;;  %v825_v21 = vsel %vm372_vm7, %v823_v9, 0.0  ;;  %v1028_v43 = vrot.slane %v986_v3, %v2324_v11 }
 0x1f1   :  { %826 = vadd.xlane.f32.xlu0 %v825_v21 }
 0x1f2   :  { %v935_v36 = vsel %vm348_vm5, %v934_v39, %v930_v56  ;;  %v1029_v6 = vsel %vm348_vm5, %v1028_v43, %v1024_v46 }
 0x1f3   :  { %v1099_v1 = vpop.xlane.xlu0 %1098  ;;  %v1002_v12 = vpop.xlane.xlu1 %1001  ;;  %v936_v48 = vsel %vm369_vm6, %v935_v36, %v916_v49 }
 0x1f4   :  { %v1047_v44 = vrot.slane %v1002_v12, %v2324_v11  ;;  %v938_v40 = vsel %vm372_vm7, %v936_v48, 0.0  ;;  %v1141_v24 = vrot.slane %v1099_v1, %v2324_v11 }
 0x1f5   :  { %939 = vadd.xlane.f32.xlu1 %v938_v40 }
 0x1f6   :  { %v1048_v19 = vsel %vm348_vm5, %v1047_v44, %v1043_v27  ;;  %v1142_v22 = vsel %vm348_vm5, %v1141_v24, %v1137_v0 }
 0x1f7   :  { %v1212_v23 = vpop.xlane.xlu0 %1211  ;;  %v1115_v45 = vpop.xlane.xlu1 %1114  ;;  %v1049_v61 = vsel %vm369_vm6, %v1048_v19, %v1029_v6  ;;  %v1506_v6 = vld [vmem:[%s2483_s3] ss:$0 sm:$0xff] }
 0x1f8   :  { %v1160_v18 = vrot.slane %v1115_v45, %v2324_v11  ;;  %v1051_v58 = vsel %vm372_vm7, %v1049_v61, 0.0  ;;  %v1254_v50 = vrot.slane %v1212_v23, %v2324_v11 }
 0x1f9   :  { %1052 = vadd.xlane.f32.xlu0 %v1051_v58 }
 0x1fa   :  { %v1161_v59 = vsel %vm348_vm5, %v1160_v18, %v1156_v15  ;;  %v1255_v33 = vsel %vm348_vm5, %v1254_v50, %v1250_v4 }
 0x1fb   :  { %v1325_v25 = vpop.xlane.xlu0 %1324  ;;  %v1228_v26 = vpop.xlane.xlu1 %1227  ;;  %v1162_v62 = vsel %vm369_vm6, %v1161_v59, %v1142_v22 }
 0x1fc   :  { %v1273_v30 = vrot.slane %v1228_v26, %v2324_v11  ;;  %v1164_v35 = vsel %vm372_vm7, %v1162_v62, 0.0  ;;  %v1367_v20 = vrot.slane %v1325_v25, %v2324_v11 }
 0x1fd   :  { %1165 = vadd.xlane.f32.xlu1 %v1164_v35 }
 0x1fe   :  { %v1274_v37 = vsel %vm348_vm5, %v1273_v30, %v1269_v2  ;;  %v1368_v42 = vsel %vm348_vm5, %v1367_v20, %v1363_v8 }
 0x1ff   :  { %v1341_v51 = vpop.xlane.xlu1 %1340  ;;  %v1275_v53 = vsel %vm369_vm6, %v1274_v37, %v1255_v33 }
 0x200   :  { %v1386_v57 = vrot.slane %v1341_v51, %v2324_v11  ;;  %v1277_v13 = vsel %vm372_vm7, %v1275_v53, 0.0 }
 0x201   :  { %1278 = vadd.xlane.f32.xlu0 %v1277_v13 }
 0x202   :  { %v1387_v34 = vsel %vm348_vm5, %v1386_v57, %v1382_v5 }
 0x203   :  { %v1388_v29 = vsel %vm369_vm6, %v1387_v34, %v1368_v42 }
 0x204   :  { %v1390_v38 = vsel %vm372_vm7, %v1388_v29, 0.0 }
 0x205   :  { %1391 = vadd.xlane.f32.xlu1 %v1390_v38 }
 0x26a   :  { %v375_v41 = vpop.xlane.xlu0 %374 }
 0x26b   :  { %v379_v3 = vsel %vm376_vm9, %v375_v41, 0.0 }
 0x26e   :  { %v488_v11 = vpop.xlane.xlu1 %487 }
 0x26f   :  { %v492_v63 = vsel %vm489_vm8, %v488_v11, 0.0 }
 0x270   :  { %v493_v9 = vadd.f32 %v492_v63, %v379_v3 }
 0x272   :  { %v601_v32 = vpop.xlane.xlu0 %600 }
 0x273   :  { %v605_v10 = vsel %vm602_vm10, %v601_v32, 0.0 }
 0x274   :  { %v606_v56 = vadd.f32 %v605_v10, %v493_v9 }
 0x276   :  { %v714_v54 = vpop.xlane.xlu1 %713 }
 0x277   :  { %v718_v21 = vsel %vm715_vm11, %v714_v54, 0.0 }
 0x278   :  { %v719_v14 = vadd.f32 %v718_v21, %v606_v56 }
 0x27a   :  { %v827_v39 = vpop.xlane.xlu0 %826 }
 0x27b   :  { %v831_v52 = vsel %vm828_vm12, %v827_v39, 0.0 }
 0x27c   :  { %v832_v36 = vadd.f32 %v831_v52, %v719_v14 }
 0x27e   :  { %v940_v60 = vpop.xlane.xlu1 %939 }
 0x27f   :  { %v944_v49 = vsel %vm941_vm13, %v940_v60, 0.0 }
 0x280   :  { %v945_v48 = vadd.f32 %v944_v49, %v832_v36 }
 0x282   :  { %v1053_v43 = vpop.xlane.xlu0 %1052 }
 0x283   :  { %v1057_v12 = vsel %vm1054_vm14, %v1053_v43, 0.0 }
 0x284   :  { %v1058_v40 = vadd.f32 %v1057_v12, %v945_v48 }
 0x286   :  { %v1166_v1 = vpop.xlane.xlu1 %1165 }
 0x287   :  { %v1170_v44 = vsel %vm1167_vm15, %v1166_v1, 0.0 }
 0x288   :  { %v1171_v16 = vadd.f32 %v1170_v44, %v1058_v40 }
 0x28a   :  { %v1279_v27 = vpop.xlane.xlu0 %1278 }
 0x28b   :  { %v1283_v46 = vsel %vm1280_vm0, %v1279_v27, 0.0 }
 0x28c   :  { %v1284_v17 = vadd.f32 %v1283_v46, %v1171_v16 }
 0x28e   :  { %v1392_v24 = vpop.xlane.xlu1 %1391 }
 0x28f   :  { %v1396_v19 = vsel %vm1393_vm1, %v1392_v24, 0.0 }
 0x290   :  { %v1397_v23 = vadd.f32 %v1396_v19, %v1284_v17 }
 0x292   :  { %v1405_v45 = vadd.f32 %v1506_v6, %v1397_v23 }
 0x294   :  { %1407 = vst.msk [vmem:[#allocation2] sm:$0x3] %vm1406_vm2, %v1405_v45 }
 0x295   :  { %1520 = shalt.err (!%p1517_p4)
}
 0x296   :  { %1417 = dma.vmem_to_hbm [thread:$0]  %s1415_s0, 32, %s2484_s4, [#allocation3]  }
 0x297   :  { %1529 = dma.done.wait [#allocation3], 32  }
 0x298   :  { %1530 = vsyncadd [#allocation3], 4294967264 }
 0x299   :  { %1421 = vsyncpa [#allocation3], 1 }

</bundles_post_ra>
